<compile_context>
chip_gen: v5e
topology: v5e:2x2
jax: 0.10.0
libtpu: 0.0.40
codegen_flags: <defaults>
</compile_context>

<pallas_src>
import functools

import jax
import jax.numpy as jnp
from jax import lax
from jax.experimental import pallas as pl
from jax.experimental.pallas import tpu as pltpu

BN_EPS = 1e-5
_INV_SQRT2 = 0.7071067811865476
_ACT_DTYPE = jnp.bfloat16          # inter-kernel activation / matmul-operand dtype


# ----------------------------------------------------------------------------
# Generation-aware VMEM budget & preferred tile sizes.
# ----------------------------------------------------------------------------
def _tpu_vmem_capacity_bytes():
    try:
        info = pltpu.get_tpu_info()
    except Exception:
        return None
    for attr in ("vmem_capacity_bytes", "vmem_size_bytes", "vmem_bytes"):
        v = getattr(info, attr, None)
        try:
            v = int(v)
        except (TypeError, ValueError):
            continue
        if v > 0:
            return v
    return None


_VMEM_CAP = _tpu_vmem_capacity_bytes()
_SMALL_VMEM = bool(_VMEM_CAP) and _VMEM_CAP <= 64 * 1024 * 1024      # v7x-class (64 MiB)
_VMEM_LIMIT = max(32 * 1024 * 1024,
                  (_VMEM_CAP - 16 * 1024 * 1024) if _VMEM_CAP else 48 * 1024 * 1024)
_TM_PREF = 512 if _SMALL_VMEM else 1024     # token-axis tile for matmul kernels
_TC_PREF = 512 if _SMALL_VMEM else 1024     # channel-axis tile for depthwise kernel


def _round_up(x, m):
    return (x + m - 1) // m * m


def _gelu_exact(x):
    # torch.nn.GELU() default: exact erf-based GELU.
    return 0.5 * x * (1.0 + lax.erf(x * _INV_SQRT2))


# ----------------------------------------------------------------------------
# Tile-size helpers (keep block shapes legal: second-to-last dim multiple of 8
# or full extent, last dim multiple of 128 or full extent).
# ----------------------------------------------------------------------------
def _pick_row_tile(m, preferred):
    if m <= preferred:
        return m
    for t in range(preferred - preferred % 8, 7, -8):
        if m % t == 0:
            return t
    if m <= 4096:
        return m          # single whole-extent block; still modest
    raise ValueError(
        f"token count {m} has no multiple-of-8 tile <= {preferred}; "
        "pad batch/spatial dims so N*Hp*Wp is a multiple of 8")


def _pick_channel_tile(c, preferred):
    if c <= preferred:
        return c
    for t in range(preferred - preferred % 128, 127, -128):
        if c % t == 0:
            return t
    return c


def _pick_batch_tile(n, t, d, itemsize, budget=8 * 1024 * 1024):
    per_row = max(1, t * d * itemsize)
    cap = max(1, budget // per_row)
    tb = 1
    for cand in range(1, min(n, cap) + 1):
        if n % cand == 0:
            tb = cand
    return tb


# ----------------------------------------------------------------------------
# BN stats -> per-channel affine (tiny glue reduction in plain JAX, f32).
# scale = gamma / sqrt(var + eps); shift = beta - mean * scale
# var is the biased batch variance, as torch BatchNorm2d in training mode.
# ----------------------------------------------------------------------------
def _bn_affine(psum, psumsq, count, gamma, beta):
    s = jnp.sum(psum[:, 0, :], axis=0)
    ss = jnp.sum(psumsq[:, 0, :], axis=0)
    mean = s / count
    var = jnp.maximum(ss / count - mean * mean, 0.0)
    scale = gamma.reshape(-1) * lax.rsqrt(var + BN_EPS)
    shift = beta.reshape(-1) - mean * scale
    return (scale.reshape(1, -1).astype(jnp.float32),
            shift.reshape(1, -1).astype(jnp.float32))


# ----------------------------------------------------------------------------
# Kernel A: tiled (M, K) @ (K, N) + bias -> GELU, emitting per-tile per-channel
# sum / sumsq partials (pass 1 of the two-pass BatchNorm).  Used for the
# patch-embedding conv (expressed as a patch matmul).  Operands are bf16,
# accumulation and stats are f32.
# ----------------------------------------------------------------------------
def _matmul_gelu_stats_kernel(x_ref, w_ref, b_ref, o_ref, sum_ref, ssq_ref):
    y = jnp.dot(x_ref[...], w_ref[...], preferred_element_type=jnp.float32)
    y = _gelu_exact(y + b_ref[...])
    o_ref[...] = y.astype(o_ref.dtype)
    sum_ref[...] = jnp.sum(y, axis=0, keepdims=True)
    ssq_ref[...] = jnp.sum(y * y, axis=0, keepdims=True)


def matmul_gelu_stats(x, w, b, *, tm=None):
    M, K = x.shape
    Kw, Nc = w.shape
    assert K == Kw
    tm = _pick_row_tile(M, tm or _TM_PREF)
    nt = M // tm
    return pl.pallas_call(
        _matmul_gelu_stats_kernel,
        out_shape=(
            jax.ShapeDtypeStruct((M, Nc), x.dtype),
            jax.ShapeDtypeStruct((nt, 1, Nc), jnp.float32),
            jax.ShapeDtypeStruct((nt, 1, Nc), jnp.float32),
        ),
        grid=(nt,),
        in_specs=[
            pl.BlockSpec((tm, K), lambda i: (i, 0)),
            pl.BlockSpec((K, Nc), lambda i: (0, 0)),
            pl.BlockSpec((1, Nc), lambda i: (0, 0)),
        ],
        out_specs=(
            pl.BlockSpec((tm, Nc), lambda i: (i, 0)),
            pl.BlockSpec((None, 1, Nc), lambda i: (i, 0, 0)),
            pl.BlockSpec((None, 1, Nc), lambda i: (i, 0, 0)),
        ),
        compiler_params=pltpu.CompilerParams(
            dimension_semantics=("parallel",),
            vmem_limit_bytes=_VMEM_LIMIT,
        ),
    )(x, w, b)


# ----------------------------------------------------------------------------
# Kernel B: fused pointwise (1x1 conv) block, tiled over tokens:
#   r = BN_dw(z) + BN_in(u)      (normalize + residual fused into the read path)
#   v = GELU(bf16(r) @ W_bf16 + b)
# plus per-tile sum/sumsq partials for the pointwise BatchNorm.
# ----------------------------------------------------------------------------
def _pw_residual_gelu_stats_kernel(z_ref, u_ref, dsc_ref, dsh_ref, isc_ref, ish_ref,
                                   w_ref, b_ref, o_ref, sum_ref, ssq_ref):
    z = z_ref[...].astype(jnp.float32)
    u = u_ref[...].astype(jnp.float32)
    r = (z * dsc_ref[...] + dsh_ref[...]) + (u * isc_ref[...] + ish_ref[...])
    y = jnp.dot(r.astype(w_ref.dtype), w_ref[...],
                preferred_element_type=jnp.float32)
    y = _gelu_exact(y + b_ref[...])
    o_ref[...] = y.astype(o_ref.dtype)
    sum_ref[...] = jnp.sum(y, axis=0, keepdims=True)
    ssq_ref[...] = jnp.sum(y * y, axis=0, keepdims=True)


def pw_residual_matmul(z, u, dw_scale, dw_shift, in_scale, in_shift, w, b, *, tm=None):
    M, C = z.shape
    Cw, Nc = w.shape
    assert C == Cw and u.shape == (M, C)
    tm = _pick_row_tile(M, tm or _TM_PREF)
    nt = M // tm
    return pl.pallas_call(
        _pw_residual_gelu_stats_kernel,
        out_shape=(
            jax.ShapeDtypeStruct((M, Nc), z.dtype),
            jax.ShapeDtypeStruct((nt, 1, Nc), jnp.float32),
            jax.ShapeDtypeStruct((nt, 1, Nc), jnp.float32),
        ),
        grid=(nt,),
        in_specs=[
            pl.BlockSpec((tm, C), lambda i: (i, 0)),
            pl.BlockSpec((tm, C), lambda i: (i, 0)),
            pl.BlockSpec((1, C), lambda i: (0, 0)),
            pl.BlockSpec((1, C), lambda i: (0, 0)),
            pl.BlockSpec((1, C), lambda i: (0, 0)),
            pl.BlockSpec((1, C), lambda i: (0, 0)),
            pl.BlockSpec((C, Nc), lambda i: (0, 0)),
            pl.BlockSpec((1, Nc), lambda i: (0, 0)),
        ],
        out_specs=(
            pl.BlockSpec((tm, Nc), lambda i: (i, 0)),
            pl.BlockSpec((None, 1, Nc), lambda i: (i, 0, 0)),
            pl.BlockSpec((None, 1, Nc), lambda i: (i, 0, 0)),
        ),
        compiler_params=pltpu.CompilerParams(
            dimension_semantics=("parallel",),
            vmem_limit_bytes=_VMEM_LIMIT,
        ),
    )(z, u, dw_scale, dw_shift, in_scale, in_shift, w, b)


# ----------------------------------------------------------------------------
# Kernel C: depthwise KxK conv ('same') block, tiled over (batch, channel-tiles):
#   x  = BN_in(u)                 (previous BN fused in)
#   z  = GELU(dwconv(x) + b_dw)
# plus per-(batch, channel-tile) sum/sumsq partials for the depthwise BatchNorm.
#
# The zero halo lives in a persistent VMEM scratch; only the halo strips are
# zeroed each step (the interior is fully overwritten).  The interior is stored
# at a sublane-aligned column offset; the tap loop reads K column-shifted slabs
# (one unaligned sublane slice per dx) and reuses each for K leading-dim row
# offsets (cheap value slices).
# ----------------------------------------------------------------------------
def _dw_gelu_stats_kernel(u_ref, isc_ref, ish_ref, w_ref, b_ref,
                          z_ref, sum_ref, ssq_ref, xpad_ref, *,
                          ksize, H, W, p_lo, p_hi, col0):
    C = u_ref.shape[-1]
    Hpad, Wpad = xpad_ref.shape[0], xpad_ref.shape[1]
    isc = isc_ref[...].reshape(1, 1, C)
    ish = ish_ref[...].reshape(1, 1, C)
    xn = u_ref[...].astype(jnp.float32) * isc + ish            # (H, W, C), normalized

    # Zero only the halo strips (all stores start at aligned sublane offsets).
    if p_lo > 0:
        xpad_ref[0:p_lo, :, :] = jnp.zeros((p_lo, Wpad, C), jnp.float32)
    if p_hi > 0:
        xpad_ref[p_lo + H:p_lo + H + p_hi, :, :] = (
            jnp.zeros((p_hi, Wpad, C), jnp.float32))
    if col0 > 0:
        xpad_ref[p_lo:p_lo + H, 0:col0, :] = jnp.zeros((H, col0, C), jnp.float32)
    col_r0 = (col0 + W) // 8 * 8          # aligned start covering the right halo
    if col_r0 < Wpad:
        xpad_ref[p_lo:p_lo + H, col_r0:Wpad, :] = (
            jnp.zeros((H, Wpad - col_r0, C), jnp.float32))
    # Interior at a sublane-aligned column offset (overwrites any overlap above).
    xpad_ref[p_lo:p_lo + H, col0:col0 + W, :] = xn

    # K column-shifted slab reads, each reused for K row taps.
    acc = jnp.zeros((H, W, C), jnp.float32)
    for dx in range(ksize):
        c0 = col0 - p_lo + dx
        slab = xpad_ref[:, c0:c0 + W, :]                       # (Hpad, W, C)
        for dy in range(ksize):
            acc = acc + slab[dy:dy + H] * w_ref[dy * ksize + dx, :]

    z = _gelu_exact(acc + b_ref[...].reshape(1, 1, C))
    z_ref[...] = z.astype(z_ref.dtype)
    sum_ref[...] = jnp.sum(z, axis=(0, 1)).reshape(1, C)
    ssq_ref[...] = jnp.sum(z * z, axis=(0, 1)).reshape(1, C)


def dw_conv_gelu_stats(u_nhwc, in_scale, in_shift, w_dw, b_dw, ksize, *, tc=None):
    N, H, W, C = u_nhwc.shape
    KK = ksize * ksize
    p_lo = (ksize - 1) // 2                 # torch padding='same' (left pad)
    p_hi = (ksize - 1) - p_lo
    col0 = _round_up(max(p_lo, 1), 8)       # sublane-aligned interior column offset
    Hpad = H + ksize - 1
    Wpad = col0 + W + p_hi
    tc = _pick_channel_tile(C, tc or _TC_PREF)
    ncs = C // tc
    kernel = functools.partial(_dw_gelu_stats_kernel, ksize=ksize, H=H, W=W,
                               p_lo=p_lo, p_hi=p_hi, col0=col0)
    return pl.pallas_call(
        kernel,
        out_shape=(
            jax.ShapeDtypeStruct((N, H, W, C), u_nhwc.dtype),
            jax.ShapeDtypeStruct((N, 1, C), jnp.float32),
            jax.ShapeDtypeStruct((N, 1, C), jnp.float32),
        ),
        grid=(N, ncs),
        in_specs=[
            pl.BlockSpec((None, H, W, tc), lambda n, c: (n, 0, 0, c)),
            pl.BlockSpec((1, tc), lambda n, c: (0, c)),
            pl.BlockSpec((1, tc), lambda n, c: (0, c)),
            pl.BlockSpec((KK, tc), lambda n, c: (0, c)),
            pl.BlockSpec((1, tc), lambda n, c: (0, c)),
        ],
        out_specs=(
            pl.BlockSpec((None, H, W, tc), lambda n, c: (n, 0, 0, c)),
            pl.BlockSpec((None, 1, tc), lambda n, c: (n, 0, c)),
            pl.BlockSpec((None, 1, tc), lambda n, c: (n, 0, c)),
        ),
        scratch_shapes=[pltpu.VMEM((Hpad, Wpad, tc), jnp.float32)],
        compiler_params=pltpu.CompilerParams(
            dimension_semantics=("parallel", "parallel"),
            vmem_limit_bytes=_VMEM_LIMIT,
        ),
    )(u_nhwc, in_scale, in_shift, w_dw, b_dw)


# ----------------------------------------------------------------------------
# Kernel D: AdaptiveAvgPool2d((1,1)) + final BN (fused as scale/shift) +
# Flatten + Linear head, tiled over batch.  The class dim is lane-padded to a
# multiple of 128 by the wrapper (sliced off afterwards).
# ----------------------------------------------------------------------------
def _pool_head_kernel(v_ref, sc_ref, sh_ref, w_ref, b_ref, o_ref):
    v = v_ref[...].astype(jnp.float32)                      # (tb, T, D)
    pooled = jnp.mean(v, axis=1) * sc_ref[...] + sh_ref[...]
    y = jnp.dot(pooled, w_ref[...], preferred_element_type=jnp.float32) + b_ref[...]
    o_ref[...] = y[:, None, :].astype(o_ref.dtype)


def pool_head(v_ntd, scale, shift, w, b):
    N, T, D = v_ntd.shape
    _, NC = w.shape
    NCp = _round_up(NC, 128)
    if NCp != NC:
        w = jnp.pad(w, ((0, 0), (0, NCp - NC)))
        b = jnp.pad(b, ((0, 0), (0, NCp - NC)))
    tb = _pick_batch_tile(N, T, D, jnp.dtype(v_ntd.dtype).itemsize)
    out = pl.pallas_call(
        _pool_head_kernel,
        out_shape=jax.ShapeDtypeStruct((N, 1, NCp), jnp.float32),
        grid=(N // tb,),
        in_specs=[
            pl.BlockSpec((tb, T, D), lambda i: (i, 0, 0)),
            pl.BlockSpec((1, D), lambda i: (0, 0)),
            pl.BlockSpec((1, D), lambda i: (0, 0)),
            pl.BlockSpec((D, NCp), lambda i: (0, 0)),
            pl.BlockSpec((1, NCp), lambda i: (0, 0)),
        ],
        out_specs=pl.BlockSpec((tb, 1, NCp), lambda i: (i, 0, 0)),
        compiler_params=pltpu.CompilerParams(
            dimension_semantics=("parallel",),
            vmem_limit_bytes=_VMEM_LIMIT,
        ),
    )(v_ntd, scale, shift, w, b)
    return out[:, 0, :NC]


# ----------------------------------------------------------------------------
# Parameter init (deterministic, synthetic) and full forward pass.
# NOTE: the patch-embed weight uses (ph, pw, cin)-ordered input features and the
# depthwise weight uses (dy*K+dx, channel) tap ordering — self-consistent with this
# init; real torch weights would need a permutation before loading.
# ----------------------------------------------------------------------------
def init_params(key, *, dim, depth, channels, kernel_size, patch_size, n_classes):
    def dense(k, fan_in, shape):
        return jax.random.normal(k, shape, jnp.float32) / jnp.sqrt(jnp.float32(fan_in))

    keys = iter(jax.random.split(key, 8 + depth * 8))
    p = {}
    fan = channels * patch_size * patch_size
    p["pe_w"] = dense(next(keys), fan, (fan, dim))
    p["pe_b"] = 0.01 * jax.random.normal(next(keys), (1, dim), jnp.float32)
    p["pe_g"] = 1.0 + 0.1 * jax.random.normal(next(keys), (1, dim), jnp.float32)
    p["pe_beta"] = 0.1 * jax.random.normal(next(keys), (1, dim), jnp.float32)
    blocks = []
    for _ in range(depth):
        blk = {}
        blk["dw_w"] = dense(next(keys), kernel_size * kernel_size,
                            (kernel_size * kernel_size, dim))
        blk["dw_b"] = 0.01 * jax.random.normal(next(keys), (1, dim), jnp.float32)
        blk["dw_g"] = 1.0 + 0.1 * jax.random.normal(next(keys), (1, dim), jnp.float32)
        blk["dw_beta"] = 0.1 * jax.random.normal(next(keys), (1, dim), jnp.float32)
        blk["pw_w"] = dense(next(keys), dim, (dim, dim))
        blk["pw_b"] = 0.01 * jax.random.normal(next(keys), (1, dim), jnp.float32)
        blk["pw_g"] = 1.0 + 0.1 * jax.random.normal(next(keys), (1, dim), jnp.float32)
        blk["pw_beta"] = 0.1 * jax.random.normal(next(keys), (1, dim), jnp.float32)
        blocks.append(blk)
    p["blocks"] = blocks
    p["head_w"] = dense(next(keys), dim, (dim, n_classes))
    p["head_b"] = 0.01 * jax.random.normal(next(keys), (1, n_classes), jnp.float32)
    return p


def convmixer_forward(x_nchw, params, *, patch_size, kernel_size):
    N, Cin, H, W = x_nchw.shape
    P = patch_size
    Hp, Wp = H // P, W // P
    M = N * Hp * Wp

    # NCHW -> NHWC, im2col patch extraction (layout glue only; matmul is in-kernel).
    # TODO(synk): fold the im2col into kernel A's BlockSpec to avoid this HBM copy.
    x = jnp.transpose(x_nchw, (0, 2, 3, 1))
    patches = (x.reshape(N, Hp, P, Wp, P, Cin)
                 .transpose(0, 1, 3, 2, 4, 5)
                 .reshape(M, P * P * Cin)).astype(_ACT_DTYPE)

    # Zero-pad the contraction dim to a full MXU pass (multiple of 256).
    KD = P * P * Cin
    KDp = _round_up(KD, 256)
    pe_w = params["pe_w"].astype(_ACT_DTYPE)
    if KDp != KD:
        patches = jnp.pad(patches, ((0, 0), (0, KDp - KD)))
        pe_w = jnp.pad(pe_w, ((0, KDp - KD), (0, 0)))

    # Patch embed: GELU(patches @ W + b) with BN stats; normalization is deferred
    # (fused into the first depthwise kernel via in_scale/in_shift).
    u, s, ss = matmul_gelu_stats(patches, pe_w, params["pe_b"])
    dim = u.shape[-1]
    in_scale, in_shift = _bn_affine(s, ss, M, params["pe_g"], params["pe_beta"])
    u = u.reshape(N, Hp, Wp, dim)

    for blk in params["blocks"]:
        # Depthwise conv + GELU (input BN fused), stats for the depthwise BN.
        z, s, ss = dw_conv_gelu_stats(u, in_scale, in_shift,
                                      blk["dw_w"], blk["dw_b"], kernel_size)
        dw_scale, dw_shift = _bn_affine(s, ss, M, blk["dw_g"], blk["dw_beta"])
        # 1x1 conv + GELU with fused (BN_dw(z) + BN_in(u)) residual, stats for BN_pw.
        v, s, ss = pw_residual_matmul(z.reshape(M, dim), u.reshape(M, dim),
                                      dw_scale, dw_shift, in_scale, in_shift,
                                      blk["pw_w"].astype(_ACT_DTYPE), blk["pw_b"])
        in_scale, in_shift = _bn_affine(s, ss, M, blk["pw_g"], blk["pw_beta"])
        u = v.reshape(N, Hp, Wp, dim)

    # AdaptiveAvgPool2d((1,1)) + final BN (as scale/shift) + Flatten + Linear.
    return pool_head(u.reshape(N, Hp * Wp, dim), in_scale, in_shift,
                     params["head_w"], params["head_b"])


# ----------------------------------------------------------------------------
# Pure-JAX reference mirroring the kernels' mixed-precision data flow
# (bf16 activations / matmul operands, f32 accumulation and BN statistics).
# ----------------------------------------------------------------------------
def _reference_forward(x_nchw, params, *, patch_size, kernel_size):
    bf = jnp.bfloat16

    def bn_affine(y2d, g, b):
        mu = jnp.mean(y2d, axis=0)
        var = jnp.maximum(jnp.mean(y2d * y2d, axis=0) - mu * mu, 0.0)
        sc = g.reshape(-1) * lax.rsqrt(var + BN_EPS)
        sh = b.reshape(-1) - mu * sc
        return sc.reshape(1, -1), sh.reshape(1, -1)

    N, Cin, H, W = x_nchw.shape
    P = patch_size
    Hp, Wp = H // P, W // P
    M = N * Hp * Wp
    x = jnp.transpose(x_nchw, (0, 2, 3, 1))
    patches = (x.reshape(N, Hp, P, Wp, P, Cin).transpose(0, 1, 3, 2, 4, 5)
                 .reshape(M, P * P * Cin))
    y = _gelu_exact(jnp.dot(patches.astype(bf), params["pe_w"].astype(bf),
                            preferred_element_type=jnp.float32) + params["pe_b"])
    dim = y.shape[-1]
    in_sc, in_sh = bn_affine(y, params["pe_g"], params["pe_beta"])
    u = y.astype(bf).reshape(N, Hp, Wp, dim)

    K = kernel_size
    p_lo = (K - 1) // 2
    p_hi = (K - 1) - p_lo
    for blk in params["blocks"]:
        xn = (u.astype(jnp.float32).reshape(M, dim) * in_sc + in_sh)
        xn = xn.reshape(N, Hp, Wp, dim)
        xp = jnp.pad(xn, ((0, 0), (p_lo, p_hi), (p_lo, p_hi), (0, 0)))
        acc = jnp.zeros((N, Hp, Wp, dim), jnp.float32)
        for dy in range(K):
            for dx in range(K):
                acc = acc + xp[:, dy:dy + Hp, dx:dx + Wp, :] * blk["dw_w"][dy * K + dx]
        z = _gelu_exact(acc + blk["dw_b"].reshape(1, 1, 1, dim))
        dw_sc, dw_sh = bn_affine(z.reshape(M, dim), blk["dw_g"], blk["dw_beta"])
        z_bf = z.astype(bf)
        r = ((z_bf.astype(jnp.float32).reshape(M, dim) * dw_sc + dw_sh)
             + (u.astype(jnp.float32).reshape(M, dim) * in_sc + in_sh))
        v = _gelu_exact(jnp.dot(r.astype(bf), blk["pw_w"].astype(bf),
                                preferred_element_type=jnp.float32) + blk["pw_b"])
        in_sc, in_sh = bn_affine(v, blk["pw_g"], blk["pw_beta"])
        u = v.astype(bf).reshape(N, Hp, Wp, dim)

    pooled = jnp.mean(u.astype(jnp.float32).reshape(N, Hp * Wp, dim), axis=1)
    pooled = pooled * in_sc + in_sh
    return jnp.dot(pooled, params["head_w"]) + params["head_b"]


if __name__ == "__main__":
    # Small config: ConvMixer(dim, depth, channels, kernel_size, patch_size, n_classes)
    dim, depth, channels = 32, 2, 4
    kernel_size, patch_size, n_classes = 3, 4, 16

    key = jax.random.PRNGKey(0)
    kx, kp = jax.random.split(key)
    x = jax.random.normal(kx, (2, channels, 16, 16), jnp.float32)  # NCHW, like torch
    params = init_params(kp, dim=dim, depth=depth, channels=channels,
                         kernel_size=kernel_size, patch_size=patch_size,
                         n_classes=n_classes)

    fwd = jax.jit(functools.partial(convmixer_forward,
                                    patch_size=patch_size, kernel_size=kernel_size))
    out = jax.block_until_ready(fwd(x, params))
    assert out.shape == (2, n_classes)
    assert bool(jnp.all(jnp.isfinite(out)))

    ref = _reference_forward(x, params, patch_size=patch_size, kernel_size=kernel_size)
    err = float(jnp.max(jnp.abs(out - ref)))
    # bf16 activation regime: the reference mirrors the same casts, so the residual
    # error is f32 summation-order / rare bf16-tie noise; 1e-2 is a safe margin.
    assert err < 1e-2, f"mismatch vs mixed-precision reference: max abs err = {err}"
    print("KERNEL_OK")
</pallas_src>

<mosaic_0001>
module attributes {stable_mosaic.version = 11 : i64} {
  func.func @_dw_gelu_stats_kernel(%arg0: i32, %arg1: i32, %arg2: memref<1x4x4x32xbf16, #tpu.memory_space<vmem>>, %arg3: memref<1x32xf32, #tpu.memory_space<vmem>>, %arg4: memref<1x32xf32, #tpu.memory_space<vmem>>, %arg5: memref<9x32xf32, #tpu.memory_space<vmem>>, %arg6: memref<1x32xf32, #tpu.memory_space<vmem>>, %arg7: memref<1x4x4x32xbf16, #tpu.memory_space<vmem>>, %arg8: memref<1x1x32xf32, #tpu.memory_space<vmem>>, %arg9: memref<1x1x32xf32, #tpu.memory_space<vmem>>, %arg10: memref<6x13x32xf32, #tpu.memory_space<vmem>>) attributes {dimension_semantics = [#tpu.dimension_semantics<parallel>, #tpu.dimension_semantics<parallel>], iteration_bounds = array<i64: 2, 1>, scalar_prefetch = 0 : i64, scratch_operands = 1 : i64, tpu.core_type = #tpu.core_type<tc>, window_params = [{transform_indices = @transform_0, window_bounds = array<i64: 1, 4, 4, 32>}, {transform_indices = @transform_1, window_bounds = array<i64: 1, 32>}, {transform_indices = @transform_2, window_bounds = array<i64: 1, 32>}, {transform_indices = @transform_3, window_bounds = array<i64: 9, 32>}, {transform_indices = @transform_4, window_bounds = array<i64: 1, 32>}, {transform_indices = @transform_5, window_bounds = array<i64: 1, 4, 4, 32>}, {transform_indices = @transform_6, window_bounds = array<i64: 1, 1, 32>}, {transform_indices = @transform_7, window_bounds = array<i64: 1, 1, 32>}]} {
    %c0 = arith.constant 0 : index
    %c0_0 = arith.constant 0 : index
    %0 = vector.load %arg3[%c0, %c0_0] : memref<1x32xf32, #tpu.memory_space<vmem>>, vector<1x32xf32>
    %1 = vector.shape_cast %0 : vector<1x32xf32> to vector<1x1x32xf32>
    %c0_1 = arith.constant 0 : index
    %c0_2 = arith.constant 0 : index
    %2 = vector.load %arg4[%c0_1, %c0_2] : memref<1x32xf32, #tpu.memory_space<vmem>>, vector<1x32xf32>
    %3 = vector.shape_cast %2 : vector<1x32xf32> to vector<1x1x32xf32>
    %c0_3 = arith.constant 0 : index
    %c0_4 = arith.constant 0 : index
    %c0_5 = arith.constant 0 : index
    %c0_6 = arith.constant 0 : index
    %4 = vector.load %arg2[%c0_3, %c0_4, %c0_5, %c0_6] : memref<1x4x4x32xbf16, #tpu.memory_space<vmem>>, vector<1x4x4x32xbf16>
    %5 = vector.shape_cast %4 : vector<1x4x4x32xbf16> to vector<4x4x32xbf16>
    %6 = arith.extf %5 : vector<4x4x32xbf16> to vector<4x4x32xf32>
    %7 = vector.broadcast %1 : vector<1x1x32xf32> to vector<4x4x32xf32>
    %8 = arith.mulf %6, %7 : vector<4x4x32xf32>
    %9 = vector.broadcast %3 : vector<1x1x32xf32> to vector<4x4x32xf32>
    %10 = arith.addf %8, %9 : vector<4x4x32xf32>
    %cst = arith.constant 0.000000e+00 : f32
    %11 = vector.broadcast %cst : f32 to vector<1x13x32xf32>
    %c0_7 = arith.constant 0 : index
    %c0_8 = arith.constant 0 : index
    %c0_9 = arith.constant 0 : index
    %12 = vector.load %arg10[%c0_7, %c0_8, %c0_9] : memref<6x13x32xf32, #tpu.memory_space<vmem>>, vector<1x13x32xf32>
    tpu.vector_store %arg10[%c0_7, %c0_8, %c0_9], %11 {strides = array<i32>} : memref<6x13x32xf32, #tpu.memory_space<vmem>>, vector<1x13x32xf32>,
    %cst_10 = arith.constant 0.000000e+00 : f32
    %13 = vector.broadcast %cst_10 : f32 to vector<1x13x32xf32>
    %c5 = arith.constant 5 : index
    %c0_11 = arith.constant 0 : index
    %c0_12 = arith.constant 0 : index
    %14 = vector.load %arg10[%c5, %c0_11, %c0_12] : memref<6x13x32xf32, #tpu.memory_space<vmem>>, vector<1x13x32xf32>
    tpu.vector_store %arg10[%c5, %c0_11, %c0_12], %13 {strides = array<i32>} : memref<6x13x32xf32, #tpu.memory_space<vmem>>, vector<1x13x32xf32>,
    %cst_13 = arith.constant 0.000000e+00 : f32
    %15 = vector.broadcast %cst_13 : f32 to vector<4x8x32xf32>
    %c1 = arith.constant 1 : index
    %c0_14 = arith.constant 0 : index
    %c0_15 = arith.constant 0 : index
    %16 = vector.load %arg10[%c1, %c0_14, %c0_15] : memref<6x13x32xf32, #tpu.memory_space<vmem>>, vector<4x8x32xf32>
    tpu.vector_store %arg10[%c1, %c0_14, %c0_15], %15 {strides = array<i32>} : memref<6x13x32xf32, #tpu.memory_space<vmem>>, vector<4x8x32xf32>,
    %cst_16 = arith.constant 0.000000e+00 : f32
    %17 = vector.broadcast %cst_16 : f32 to vector<4x5x32xf32>
    %c1_17 = arith.constant 1 : index
    %c8 = arith.constant 8 : index
    %c0_18 = arith.constant 0 : index
    %18 = vector.load %arg10[%c1_17, %c8, %c0_18] : memref<6x13x32xf32, #tpu.memory_space<vmem>>, vector<4x5x32xf32>
    tpu.vector_store %arg10[%c1_17, %c8, %c0_18], %17 {strides = array<i32>} : memref<6x13x32xf32, #tpu.memory_space<vmem>>, vector<4x5x32xf32>,
    %c1_19 = arith.constant 1 : index
    %c8_20 = arith.constant 8 : index
    %c0_21 = arith.constant 0 : index
    %19 = vector.load %arg10[%c1_19, %c8_20, %c0_21] : memref<6x13x32xf32, #tpu.memory_space<vmem>>, vector<4x4x32xf32>
    tpu.vector_store %arg10[%c1_19, %c8_20, %c0_21], %10 {strides = array<i32>} : memref<6x13x32xf32, #tpu.memory_space<vmem>>, vector<4x4x32xf32>,
    %cst_22 = arith.constant 0.000000e+00 : f32
    %20 = vector.broadcast %cst_22 : f32 to vector<4x4x32xf32>
    %c0_23 = arith.constant 0 : index
    %c7 = arith.constant 7 : index
    %c0_24 = arith.constant 0 : index
    %21 = vector.load %arg10[%c0_23, %c7, %c0_24] : memref<6x13x32xf32, #tpu.memory_space<vmem>>, vector<6x4x32xf32>
    %22 = vector.extract_strided_slice %21 {offsets = [0, 0, 0], sizes = [4, 4, 32], strides = [1, 1, 1]} : vector<6x4x32xf32> to vector<4x4x32xf32>
    %c0_25 = arith.constant 0 : index
    %c0_26 = arith.constant 0 : index
    %23 = vector.load %arg5[%c0_25, %c0_26] : memref<9x32xf32, #tpu.memory_space<vmem>>, vector<1x32xf32>
    %24 = vector.shape_cast %23 : vector<1x32xf32> to vector<32xf32>
    %25 = vector.shape_cast %24 : vector<32xf32> to vector<1x1x32xf32>
    %26 = vector.broadcast %25 : vector<1x1x32xf32> to vector<4x4x32xf32>
    %27 = arith.mulf %22, %26 : vector<4x4x32xf32>
    %28 = arith.addf %20, %27 : vector<4x4x32xf32>
    %29 = vector.extract_strided_slice %21 {offsets = [1, 0, 0], sizes = [4, 4, 32], strides = [1, 1, 1]} : vector<6x4x32xf32> to vector<4x4x32xf32>
    %c3 = arith.constant 3 : index
    %c0_27 = arith.constant 0 : index
    %30 = vector.load %arg5[%c3, %c0_27] : memref<9x32xf32, #tpu.memory_space<vmem>>, vector<1x32xf32>
    %31 = vector.shape_cast %30 : vector<1x32xf32> to vector<32xf32>
    %32 = vector.shape_cast %31 : vector<32xf32> to vector<1x1x32xf32>
    %33 = vector.broadcast %32 : vector<1x1x32xf32> to vector<4x4x32xf32>
    %34 = arith.mulf %29, %33 : vector<4x4x32xf32>
    %35 = arith.addf %28, %34 : vector<4x4x32xf32>
    %36 = vector.extract_strided_slice %21 {offsets = [2, 0, 0], sizes = [4, 4, 32], strides = [1, 1, 1]} : vector<6x4x32xf32> to vector<4x4x32xf32>
    %c6 = arith.constant 6 : index
    %c0_28 = arith.constant 0 : index
    %37 = vector.load %arg5[%c6, %c0_28] : memref<9x32xf32, #tpu.memory_space<vmem>>, vector<1x32xf32>
    %38 = vector.shape_cast %37 : vector<1x32xf32> to vector<32xf32>
    %39 = vector.shape_cast %38 : vector<32xf32> to vector<1x1x32xf32>
    %40 = vector.broadcast %39 : vector<1x1x32xf32> to vector<4x4x32xf32>
    %41 = arith.mulf %36, %40 : vector<4x4x32xf32>
    %42 = arith.addf %35, %41 : vector<4x4x32xf32>
    %c0_29 = arith.constant 0 : index
    %c8_30 = arith.constant 8 : index
    %c0_31 = arith.constant 0 : index
    %43 = vector.load %arg10[%c0_29, %c8_30, %c0_31] : memref<6x13x32xf32, #tpu.memory_space<vmem>>, vector<6x4x32xf32>
    %44 = vector.extract_strided_slice %43 {offsets = [0, 0, 0], sizes = [4, 4, 32], strides = [1, 1, 1]} : vector<6x4x32xf32> to vector<4x4x32xf32>
    %c1_32 = arith.constant 1 : index
    %c0_33 = arith.constant 0 : index
    %45 = vector.load %arg5[%c1_32, %c0_33] : memref<9x32xf32, #tpu.memory_space<vmem>>, vector<1x32xf32>
    %46 = vector.shape_cast %45 : vector<1x32xf32> to vector<32xf32>
    %47 = vector.shape_cast %46 : vector<32xf32> to vector<1x1x32xf32>
    %48 = vector.broadcast %47 : vector<1x1x32xf32> to vector<4x4x32xf32>
    %49 = arith.mulf %44, %48 : vector<4x4x32xf32>
    %50 = arith.addf %42, %49 : vector<4x4x32xf32>
    %51 = vector.extract_strided_slice %43 {offsets = [1, 0, 0], sizes = [4, 4, 32], strides = [1, 1, 1]} : vector<6x4x32xf32> to vector<4x4x32xf32>
    %c4 = arith.constant 4 : index
    %c0_34 = arith.constant 0 : index
    %52 = vector.load %arg5[%c4, %c0_34] : memref<9x32xf32, #tpu.memory_space<vmem>>, vector<1x32xf32>
    %53 = vector.shape_cast %52 : vector<1x32xf32> to vector<32xf32>
    %54 = vector.shape_cast %53 : vector<32xf32> to vector<1x1x32xf32>
    %55 = vector.broadcast %54 : vector<1x1x32xf32> to vector<4x4x32xf32>
    %56 = arith.mulf %51, %55 : vector<4x4x32xf32>
    %57 = arith.addf %50, %56 : vector<4x4x32xf32>
    %58 = vector.extract_strided_slice %43 {offsets = [2, 0, 0], sizes = [4, 4, 32], strides = [1, 1, 1]} : vector<6x4x32xf32> to vector<4x4x32xf32>
    %c7_35 = arith.constant 7 : index
    %c0_36 = arith.constant 0 : index
    %59 = vector.load %arg5[%c7_35, %c0_36] : memref<9x32xf32, #tpu.memory_space<vmem>>, vector<1x32xf32>
    %60 = vector.shape_cast %59 : vector<1x32xf32> to vector<32xf32>
    %61 = vector.shape_cast %60 : vector<32xf32> to vector<1x1x32xf32>
    %62 = vector.broadcast %61 : vector<1x1x32xf32> to vector<4x4x32xf32>
    %63 = arith.mulf %58, %62 : vector<4x4x32xf32>
    %64 = arith.addf %57, %63 : vector<4x4x32xf32>
    %c0_37 = arith.constant 0 : index
    %c9 = arith.constant 9 : index
    %c0_38 = arith.constant 0 : index
    %65 = vector.load %arg10[%c0_37, %c9, %c0_38] : memref<6x13x32xf32, #tpu.memory_space<vmem>>, vector<6x4x32xf32>
    %66 = vector.extract_strided_slice %65 {offsets = [0, 0, 0], sizes = [4, 4, 32], strides = [1, 1, 1]} : vector<6x4x32xf32> to vector<4x4x32xf32>
    %c2 = arith.constant 2 : index
    %c0_39 = arith.constant 0 : index
    %67 = vector.load %arg5[%c2, %c0_39] : memref<9x32xf32, #tpu.memory_space<vmem>>, vector<1x32xf32>
    %68 = vector.shape_cast %67 : vector<1x32xf32> to vector<32xf32>
    %69 = vector.shape_cast %68 : vector<32xf32> to vector<1x1x32xf32>
    %70 = vector.broadcast %69 : vector<1x1x32xf32> to vector<4x4x32xf32>
    %71 = arith.mulf %66, %70 : vector<4x4x32xf32>
    %72 = arith.addf %64, %71 : vector<4x4x32xf32>
    %73 = vector.extract_strided_slice %65 {offsets = [1, 0, 0], sizes = [4, 4, 32], strides = [1, 1, 1]} : vector<6x4x32xf32> to vector<4x4x32xf32>
    %c5_40 = arith.constant 5 : index
    %c0_41 = arith.constant 0 : index
    %74 = vector.load %arg5[%c5_40, %c0_41] : memref<9x32xf32, #tpu.memory_space<vmem>>, vector<1x32xf32>
    %75 = vector.shape_cast %74 : vector<1x32xf32> to vector<32xf32>
    %76 = vector.shape_cast %75 : vector<32xf32> to vector<1x1x32xf32>
    %77 = vector.broadcast %76 : vector<1x1x32xf32> to vector<4x4x32xf32>
    %78 = arith.mulf %73, %77 : vector<4x4x32xf32>
    %79 = arith.addf %72, %78 : vector<4x4x32xf32>
    %80 = vector.extract_strided_slice %65 {offsets = [2, 0, 0], sizes = [4, 4, 32], strides = [1, 1, 1]} : vector<6x4x32xf32> to vector<4x4x32xf32>
    %c8_42 = arith.constant 8 : index
    %c0_43 = arith.constant 0 : index
    %81 = vector.load %arg5[%c8_42, %c0_43] : memref<9x32xf32, #tpu.memory_space<vmem>>, vector<1x32xf32>
    %82 = vector.shape_cast %81 : vector<1x32xf32> to vector<32xf32>
    %83 = vector.shape_cast %82 : vector<32xf32> to vector<1x1x32xf32>
    %84 = vector.broadcast %83 : vector<1x1x32xf32> to vector<4x4x32xf32>
    %85 = arith.mulf %80, %84 : vector<4x4x32xf32>
    %86 = arith.addf %79, %85 : vector<4x4x32xf32>
    %c0_44 = arith.constant 0 : index
    %c0_45 = arith.constant 0 : index
    %87 = vector.load %arg6[%c0_44, %c0_45] : memref<1x32xf32, #tpu.memory_space<vmem>>, vector<1x32xf32>
    %88 = vector.shape_cast %87 : vector<1x32xf32> to vector<1x1x32xf32>
    %89 = vector.broadcast %88 : vector<1x1x32xf32> to vector<4x4x32xf32>
    %90 = arith.addf %86, %89 : vector<4x4x32xf32>
    %cst_46 = arith.constant 5.000000e-01 : f32
    %91 = vector.broadcast %cst_46 : f32 to vector<4x4x32xf32>
    %92 = arith.mulf %91, %90 : vector<4x4x32xf32>
    %cst_47 = arith.constant 0.707106769 : f32
    %93 = vector.broadcast %cst_47 : f32 to vector<4x4x32xf32>
    %94 = arith.mulf %90, %93 : vector<4x4x32xf32>
    %95 = math.erf %94 : vector<4x4x32xf32>
    %cst_48 = arith.constant 1.000000e+00 : f32
    %96 = vector.broadcast %cst_48 : f32 to vector<4x4x32xf32>
    %97 = arith.addf %96, %95 : vector<4x4x32xf32>
    %98 = arith.mulf %92, %97 : vector<4x4x32xf32>
    %99 = arith.truncf %98 : vector<4x4x32xf32> to vector<4x4x32xbf16>
    %c0_49 = arith.constant 0 : index
    %c0_50 = arith.constant 0 : index
    %c0_51 = arith.constant 0 : index
    %c0_52 = arith.constant 0 : index
    %100 = vector.load %arg7[%c0_49, %c0_50, %c0_51, %c0_52] : memref<1x4x4x32xbf16, #tpu.memory_space<vmem>>, vector<1x4x4x32xbf16>
    %101 = vector.shape_cast %100 : vector<1x4x4x32xbf16> to vector<4x4x32xbf16>
    %102 = vector.shape_cast %99 : vector<4x4x32xbf16> to vector<1x4x4x32xbf16>
    tpu.vector_store %arg7[%c0_49, %c0_50, %c0_51, %c0_52], %102 {strides = array<i32>} : memref<1x4x4x32xbf16, #tpu.memory_space<vmem>>, vector<1x4x4x32xbf16>,
    %cst_53 = arith.constant dense<0.000000e+00> : vector<32xf32>
    %103 = vector.multi_reduction <add>, %98, %cst_53 [0, 1] : vector<4x4x32xf32> to vector<32xf32>
    %104 = vector.shape_cast %103 : vector<32xf32> to vector<1x32xf32>
    %c0_54 = arith.constant 0 : index
    %c0_55 = arith.constant 0 : index
    %c0_56 = arith.constant 0 : index
    %105 = vector.load %arg8[%c0_54, %c0_55, %c0_56] : memref<1x1x32xf32, #tpu.memory_space<vmem>>, vector<1x1x32xf32>
    %106 = vector.shape_cast %105 : vector<1x1x32xf32> to vector<1x32xf32>
    %107 = vector.shape_cast %104 : vector<1x32xf32> to vector<1x1x32xf32>
    tpu.vector_store %arg8[%c0_54, %c0_55, %c0_56], %107 {strides = array<i32>} : memref<1x1x32xf32, #tpu.memory_space<vmem>>, vector<1x1x32xf32>,
    %108 = arith.mulf %98, %98 : vector<4x4x32xf32>
    %cst_57 = arith.constant dense<0.000000e+00> : vector<32xf32>
    %109 = vector.multi_reduction <add>, %108, %cst_57 [0, 1] : vector<4x4x32xf32> to vector<32xf32>
    %110 = vector.shape_cast %109 : vector<32xf32> to vector<1x32xf32>
    %c0_58 = arith.constant 0 : index
    %c0_59 = arith.constant 0 : index
    %c0_60 = arith.constant 0 : index
    %111 = vector.load %arg9[%c0_58, %c0_59, %c0_60] : memref<1x1x32xf32, #tpu.memory_space<vmem>>, vector<1x1x32xf32>
    %112 = vector.shape_cast %111 : vector<1x1x32xf32> to vector<1x32xf32>
    %113 = vector.shape_cast %110 : vector<1x32xf32> to vector<1x1x32xf32>
    tpu.vector_store %arg9[%c0_58, %c0_59, %c0_60], %113 {strides = array<i32>} : memref<1x1x32xf32, #tpu.memory_space<vmem>>, vector<1x1x32xf32>,
    return
  }
  func.func @transform_0(%arg0: i32, %arg1: i32) -> (i32, i32, i32, i32) {
    %c0_i32 = arith.constant 0 : i32
    %c0_i32_0 = arith.constant 0 : i32
    %c0_i32_1 = arith.constant 0 : i32
    return %arg0, %c0_i32, %c0_i32_0, %arg1 : i32, i32, i32, i32
  }
  func.func @transform_1(%arg0: i32, %arg1: i32) -> (i32, i32) {
    %c0_i32 = arith.constant 0 : i32
    %c0_i32_0 = arith.constant 0 : i32
    return %c0_i32, %arg1 : i32, i32
  }
  func.func @transform_2(%arg0: i32, %arg1: i32) -> (i32, i32) {
    %c0_i32 = arith.constant 0 : i32
    %c0_i32_0 = arith.constant 0 : i32
    return %c0_i32, %arg1 : i32, i32
  }
  func.func @transform_3(%arg0: i32, %arg1: i32) -> (i32, i32) {
    %c0_i32 = arith.constant 0 : i32
    %c0_i32_0 = arith.constant 0 : i32
    return %c0_i32, %arg1 : i32, i32
  }
  func.func @transform_4(%arg0: i32, %arg1: i32) -> (i32, i32) {
    %c0_i32 = arith.constant 0 : i32
    %c0_i32_0 = arith.constant 0 : i32
    return %c0_i32, %arg1 : i32, i32
  }
  func.func @transform_5(%arg0: i32, %arg1: i32) -> (i32, i32, i32, i32) {
    %c0_i32 = arith.constant 0 : i32
    %c0_i32_0 = arith.constant 0 : i32
    %c0_i32_1 = arith.constant 0 : i32
    return %arg0, %c0_i32, %c0_i32_0, %arg1 : i32, i32, i32, i32
  }
  func.func @transform_6(%arg0: i32, %arg1: i32) -> (i32, i32, i32) {
    %c0_i32 = arith.constant 0 : i32
    %c0_i32_0 = arith.constant 0 : i32
    return %arg0, %c0_i32, %arg1 : i32, i32, i32
  }
  func.func @transform_7(%arg0: i32, %arg1: i32) -> (i32, i32, i32) {
    %c0_i32 = arith.constant 0 : i32
    %c0_i32_0 = arith.constant 0 : i32
    return %arg0, %c0_i32, %arg1 : i32, i32, i32
  }
}

module attributes {stable_mosaic.version = 11 : i64} {
  func.func @_matmul_gelu_stats_kernel(%arg0: i32, %arg1: memref<32x256xbf16, #tpu.memory_space<vmem>>, %arg2: memref<256x32xbf16, #tpu.memory_space<vmem>>, %arg3: memref<1x32xf32, #tpu.memory_space<vmem>>, %arg4: memref<32x32xbf16, #tpu.memory_space<vmem>>, %arg5: memref<1x1x32xf32, #tpu.memory_space<vmem>>, %arg6: memref<1x1x32xf32, #tpu.memory_space<vmem>>) attributes {dimension_semantics = [#tpu.dimension_semantics<parallel>], iteration_bounds = array<i64: 1>, scalar_prefetch = 0 : i64, scratch_operands = 0 : i64, tpu.core_type = #tpu.core_type<tc>, window_params = [{transform_indices = @transform_0, window_bounds = array<i64: 32, 256>}, {pipeline_mode = #tpu.pipeline_mode<synchronous>, transform_indices = @transform_1, window_bounds = array<i64: 256, 32>}, {pipeline_mode = #tpu.pipeline_mode<synchronous>, transform_indices = @transform_2, window_bounds = array<i64: 1, 32>}, {transform_indices = @transform_3, window_bounds = array<i64: 32, 32>}, {transform_indices = @transform_4, window_bounds = array<i64: 1, 1, 32>}, {transform_indices = @transform_5, window_bounds = array<i64: 1, 1, 32>}]} {
    %c0 = arith.constant 0 : index
    %c0_0 = arith.constant 0 : index
    %0 = vector.load %arg1[%c0, %c0_0] : memref<32x256xbf16, #tpu.memory_space<vmem>>, vector<32x256xbf16>
    %c0_1 = arith.constant 0 : index
    %c0_2 = arith.constant 0 : index
    %1 = vector.load %arg2[%c0_1, %c0_2] : memref<256x32xbf16, #tpu.memory_space<vmem>>, vector<256x32xbf16>
    %cst = arith.constant dense<0.000000e+00> : vector<32x32xf32>
    %2 = tpu.matmul %0, %1, %cst {dimension_numbers = #tpu.dot_dimension_numbers<[1], [0], [0], [1], [0, 0, 1, 1], [], []>} : vector<32x256xbf16>, vector<256x32xbf16>, vector<32x32xf32> -> vector<32x32xf32>
    %c0_3 = arith.constant 0 : index
    %c0_4 = arith.constant 0 : index
    %3 = vector.load %arg3[%c0_3, %c0_4] : memref<1x32xf32, #tpu.memory_space<vmem>>, vector<1x32xf32>
    %4 = vector.broadcast %3 : vector<1x32xf32> to vector<32x32xf32>
    %5 = arith.addf %2, %4 : vector<32x32xf32>
    %cst_5 = arith.constant 5.000000e-01 : f32
    %6 = vector.broadcast %cst_5 : f32 to vector<32x32xf32>
    %7 = arith.mulf %6, %5 : vector<32x32xf32>
    %cst_6 = arith.constant 0.707106769 : f32
    %8 = vector.broadcast %cst_6 : f32 to vector<32x32xf32>
    %9 = arith.mulf %5, %8 : vector<32x32xf32>
    %10 = math.erf %9 : vector<32x32xf32>
    %cst_7 = arith.constant 1.000000e+00 : f32
    %11 = vector.broadcast %cst_7 : f32 to vector<32x32xf32>
    %12 = arith.addf %11, %10 : vector<32x32xf32>
    %13 = arith.mulf %7, %12 : vector<32x32xf32>
    %14 = arith.truncf %13 : vector<32x32xf32> to vector<32x32xbf16>
    %c0_8 = arith.constant 0 : index
    %c0_9 = arith.constant 0 : index
    %15 = vector.load %arg4[%c0_8, %c0_9] : memref<32x32xbf16, #tpu.memory_space<vmem>>, vector<32x32xbf16>
    tpu.vector_store %arg4[%c0_8, %c0_9], %14 {strides = array<i32>} : memref<32x32xbf16, #tpu.memory_space<vmem>>, vector<32x32xbf16>,
    %cst_10 = arith.constant dense<0.000000e+00> : vector<32xf32>
    %16 = vector.multi_reduction <add>, %13, %cst_10 [0] : vector<32x32xf32> to vector<32xf32>
    %17 = vector.shape_cast %16 : vector<32xf32> to vector<1x32xf32>
    %c0_11 = arith.constant 0 : index
    %c0_12 = arith.constant 0 : index
    %c0_13 = arith.constant 0 : index
    %18 = vector.load %arg5[%c0_11, %c0_12, %c0_13] : memref<1x1x32xf32, #tpu.memory_space<vmem>>, vector<1x1x32xf32>
    %19 = vector.shape_cast %18 : vector<1x1x32xf32> to vector<1x32xf32>
    %20 = vector.shape_cast %17 : vector<1x32xf32> to vector<1x1x32xf32>
    tpu.vector_store %arg5[%c0_11, %c0_12, %c0_13], %20 {strides = array<i32>} : memref<1x1x32xf32, #tpu.memory_space<vmem>>, vector<1x1x32xf32>,
    %21 = arith.mulf %13, %13 : vector<32x32xf32>
    %cst_14 = arith.constant dense<0.000000e+00> : vector<32xf32>
    %22 = vector.multi_reduction <add>, %21, %cst_14 [0] : vector<32x32xf32> to vector<32xf32>
    %23 = vector.shape_cast %22 : vector<32xf32> to vector<1x32xf32>
    %c0_15 = arith.constant 0 : index
    %c0_16 = arith.constant 0 : index
    %c0_17 = arith.constant 0 : index
    %24 = vector.load %arg6[%c0_15, %c0_16, %c0_17] : memref<1x1x32xf32, #tpu.memory_space<vmem>>, vector<1x1x32xf32>
    %25 = vector.shape_cast %24 : vector<1x1x32xf32> to vector<1x32xf32>
    %26 = vector.shape_cast %23 : vector<1x32xf32> to vector<1x1x32xf32>
    tpu.vector_store %arg6[%c0_15, %c0_16, %c0_17], %26 {strides = array<i32>} : memref<1x1x32xf32, #tpu.memory_space<vmem>>, vector<1x1x32xf32>,
    return
  }
  func.func @transform_0(%arg0: i32) -> (i32, i32) {
    %c0_i32 = arith.constant 0 : i32
    %c0_i32_0 = arith.constant 0 : i32
    return %arg0, %c0_i32 : i32, i32
  }
  func.func @transform_1(%arg0: i32) -> (i32, i32) {
    %c0_i32 = arith.constant 0 : i32
    %c0_i32_0 = arith.constant 0 : i32
    %c0_i32_1 = arith.constant 0 : i32
    return %c0_i32, %c0_i32_0 : i32, i32
  }
  func.func @transform_2(%arg0: i32) -> (i32, i32) {
    %c0_i32 = arith.constant 0 : i32
    %c0_i32_0 = arith.constant 0 : i32
    %c0_i32_1 = arith.constant 0 : i32
    return %c0_i32, %c0_i32_0 : i32, i32
  }
  func.func @transform_3(%arg0: i32) -> (i32, i32) {
    %c0_i32 = arith.constant 0 : i32
    %c0_i32_0 = arith.constant 0 : i32
    return %arg0, %c0_i32 : i32, i32
  }
  func.func @transform_4(%arg0: i32) -> (i32, i32, i32) {
    %c0_i32 = arith.constant 0 : i32
    %c0_i32_0 = arith.constant 0 : i32
    %c0_i32_1 = arith.constant 0 : i32
    return %arg0, %c0_i32, %c0_i32_0 : i32, i32, i32
  }
  func.func @transform_5(%arg0: i32) -> (i32, i32, i32) {
    %c0_i32 = arith.constant 0 : i32
    %c0_i32_0 = arith.constant 0 : i32
    %c0_i32_1 = arith.constant 0 : i32
    return %arg0, %c0_i32, %c0_i32_0 : i32, i32, i32
  }
}

module attributes {stable_mosaic.version = 11 : i64} {
  func.func @_pw_residual_gelu_stats_kernel(%arg0: i32, %arg1: memref<32x32xbf16, #tpu.memory_space<vmem>>, %arg2: memref<32x32xbf16, #tpu.memory_space<vmem>>, %arg3: memref<1x32xf32, #tpu.memory_space<vmem>>, %arg4: memref<1x32xf32, #tpu.memory_space<vmem>>, %arg5: memref<1x32xf32, #tpu.memory_space<vmem>>, %arg6: memref<1x32xf32, #tpu.memory_space<vmem>>, %arg7: memref<32x32xbf16, #tpu.memory_space<vmem>>, %arg8: memref<1x32xf32, #tpu.memory_space<vmem>>, %arg9: memref<32x32xbf16, #tpu.memory_space<vmem>>, %arg10: memref<1x1x32xf32, #tpu.memory_space<vmem>>, %arg11: memref<1x1x32xf32, #tpu.memory_space<vmem>>) attributes {dimension_semantics = [#tpu.dimension_semantics<parallel>], iteration_bounds = array<i64: 1>, scalar_prefetch = 0 : i64, scratch_operands = 0 : i64, tpu.core_type = #tpu.core_type<tc>, window_params = [{transform_indices = @transform_0, window_bounds = array<i64: 32, 32>}, {transform_indices = @transform_1, window_bounds = array<i64: 32, 32>}, {pipeline_mode = #tpu.pipeline_mode<synchronous>, transform_indices = @transform_2, window_bounds = array<i64: 1, 32>}, {pipeline_mode = #tpu.pipeline_mode<synchronous>, transform_indices = @transform_3, window_bounds = array<i64: 1, 32>}, {pipeline_mode = #tpu.pipeline_mode<synchronous>, transform_indices = @transform_4, window_bounds = array<i64: 1, 32>}, {pipeline_mode = #tpu.pipeline_mode<synchronous>, transform_indices = @transform_5, window_bounds = array<i64: 1, 32>}, {pipeline_mode = #tpu.pipeline_mode<synchronous>, transform_indices = @transform_6, window_bounds = array<i64: 32, 32>}, {pipeline_mode = #tpu.pipeline_mode<synchronous>, transform_indices = @transform_7, window_bounds = array<i64: 1, 32>}, {transform_indices = @transform_8, window_bounds = array<i64: 32, 32>}, {transform_indices = @transform_9, window_bounds = array<i64: 1, 1, 32>}, {transform_indices = @transform_10, window_bounds = array<i64: 1, 1, 32>}]} {
    %c0 = arith.constant 0 : index
    %c0_0 = arith.constant 0 : index
    %0 = vector.load %arg1[%c0, %c0_0] : memref<32x32xbf16, #tpu.memory_space<vmem>>, vector<32x32xbf16>
    %1 = arith.extf %0 : vector<32x32xbf16> to vector<32x32xf32>
    %c0_1 = arith.constant 0 : index
    %c0_2 = arith.constant 0 : index
    %2 = vector.load %arg2[%c0_1, %c0_2] : memref<32x32xbf16, #tpu.memory_space<vmem>>, vector<32x32xbf16>
    %3 = arith.extf %2 : vector<32x32xbf16> to vector<32x32xf32>
    %c0_3 = arith.constant 0 : index
    %c0_4 = arith.constant 0 : index
    %4 = vector.load %arg3[%c0_3, %c0_4] : memref<1x32xf32, #tpu.memory_space<vmem>>, vector<1x32xf32>
    %5 = vector.broadcast %4 : vector<1x32xf32> to vector<32x32xf32>
    %6 = arith.mulf %1, %5 : vector<32x32xf32>
    %c0_5 = arith.constant 0 : index
    %c0_6 = arith.constant 0 : index
    %7 = vector.load %arg4[%c0_5, %c0_6] : memref<1x32xf32, #tpu.memory_space<vmem>>, vector<1x32xf32>
    %8 = vector.broadcast %7 : vector<1x32xf32> to vector<32x32xf32>
    %9 = arith.addf %6, %8 : vector<32x32xf32>
    %c0_7 = arith.constant 0 : index
    %c0_8 = arith.constant 0 : index
    %10 = vector.load %arg5[%c0_7, %c0_8] : memref<1x32xf32, #tpu.memory_space<vmem>>, vector<1x32xf32>
    %11 = vector.broadcast %10 : vector<1x32xf32> to vector<32x32xf32>
    %12 = arith.mulf %3, %11 : vector<32x32xf32>
    %c0_9 = arith.constant 0 : index
    %c0_10 = arith.constant 0 : index
    %13 = vector.load %arg6[%c0_9, %c0_10] : memref<1x32xf32, #tpu.memory_space<vmem>>, vector<1x32xf32>
    %14 = vector.broadcast %13 : vector<1x32xf32> to vector<32x32xf32>
    %15 = arith.addf %12, %14 : vector<32x32xf32>
    %16 = arith.addf %9, %15 : vector<32x32xf32>
    %17 = arith.truncf %16 : vector<32x32xf32> to vector<32x32xbf16>
    %c0_11 = arith.constant 0 : index
    %c0_12 = arith.constant 0 : index
    %18 = vector.load %arg7[%c0_11, %c0_12] : memref<32x32xbf16, #tpu.memory_space<vmem>>, vector<32x32xbf16>
    %cst = arith.constant dense<0.000000e+00> : vector<32x32xf32>
    %19 = tpu.matmul %17, %18, %cst {dimension_numbers = #tpu.dot_dimension_numbers<[1], [0], [0], [1], [0, 0, 1, 1], [], []>} : vector<32x32xbf16>, vector<32x32xbf16>, vector<32x32xf32> -> vector<32x32xf32>
    %c0_13 = arith.constant 0 : index
    %c0_14 = arith.constant 0 : index
    %20 = vector.load %arg8[%c0_13, %c0_14] : memref<1x32xf32, #tpu.memory_space<vmem>>, vector<1x32xf32>
    %21 = vector.broadcast %20 : vector<1x32xf32> to vector<32x32xf32>
    %22 = arith.addf %19, %21 : vector<32x32xf32>
    %cst_15 = arith.constant 5.000000e-01 : f32
    %23 = vector.broadcast %cst_15 : f32 to vector<32x32xf32>
    %24 = arith.mulf %23, %22 : vector<32x32xf32>
    %cst_16 = arith.constant 0.707106769 : f32
    %25 = vector.broadcast %cst_16 : f32 to vector<32x32xf32>
    %26 = arith.mulf %22, %25 : vector<32x32xf32>
    %27 = math.erf %26 : vector<32x32xf32>
    %cst_17 = arith.constant 1.000000e+00 : f32
    %28 = vector.broadcast %cst_17 : f32 to vector<32x32xf32>
    %29 = arith.addf %28, %27 : vector<32x32xf32>
    %30 = arith.mulf %24, %29 : vector<32x32xf32>
    %31 = arith.truncf %30 : vector<32x32xf32> to vector<32x32xbf16>
    %c0_18 = arith.constant 0 : index
    %c0_19 = arith.constant 0 : index
    %32 = vector.load %arg9[%c0_18, %c0_19] : memref<32x32xbf16, #tpu.memory_space<vmem>>, vector<32x32xbf16>
    tpu.vector_store %arg9[%c0_18, %c0_19], %31 {strides = array<i32>} : memref<32x32xbf16, #tpu.memory_space<vmem>>, vector<32x32xbf16>,
    %cst_20 = arith.constant dense<0.000000e+00> : vector<32xf32>
    %33 = vector.multi_reduction <add>, %30, %cst_20 [0] : vector<32x32xf32> to vector<32xf32>
    %34 = vector.shape_cast %33 : vector<32xf32> to vector<1x32xf32>
    %c0_21 = arith.constant 0 : index
    %c0_22 = arith.constant 0 : index
    %c0_23 = arith.constant 0 : index
    %35 = vector.load %arg10[%c0_21, %c0_22, %c0_23] : memref<1x1x32xf32, #tpu.memory_space<vmem>>, vector<1x1x32xf32>
    %36 = vector.shape_cast %35 : vector<1x1x32xf32> to vector<1x32xf32>
    %37 = vector.shape_cast %34 : vector<1x32xf32> to vector<1x1x32xf32>
    tpu.vector_store %arg10[%c0_21, %c0_22, %c0_23], %37 {strides = array<i32>} : memref<1x1x32xf32, #tpu.memory_space<vmem>>, vector<1x1x32xf32>,
    %38 = arith.mulf %30, %30 : vector<32x32xf32>
    %cst_24 = arith.constant dense<0.000000e+00> : vector<32xf32>
    %39 = vector.multi_reduction <add>, %38, %cst_24 [0] : vector<32x32xf32> to vector<32xf32>
    %40 = vector.shape_cast %39 : vector<32xf32> to vector<1x32xf32>
    %c0_25 = arith.constant 0 : index
    %c0_26 = arith.constant 0 : index
    %c0_27 = arith.constant 0 : index
    %41 = vector.load %arg11[%c0_25, %c0_26, %c0_27] : memref<1x1x32xf32, #tpu.memory_space<vmem>>, vector<1x1x32xf32>
    %42 = vector.shape_cast %41 : vector<1x1x32xf32> to vector<1x32xf32>
    %43 = vector.shape_cast %40 : vector<1x32xf32> to vector<1x1x32xf32>
    tpu.vector_store %arg11[%c0_25, %c0_26, %c0_27], %43 {strides = array<i32>} : memref<1x1x32xf32, #tpu.memory_space<vmem>>, vector<1x1x32xf32>,
    return
  }
  func.func @transform_0(%arg0: i32) -> (i32, i32) {
    %c0_i32 = arith.constant 0 : i32
    %c0_i32_0 = arith.constant 0 : i32
    return %arg0, %c0_i32 : i32, i32
  }
  func.func @transform_1(%arg0: i32) -> (i32, i32) {
    %c0_i32 = arith.constant 0 : i32
    %c0_i32_0 = arith.constant 0 : i32
    return %arg0, %c0_i32 : i32, i32
  }
  func.func @transform_2(%arg0: i32) -> (i32, i32) {
    %c0_i32 = arith.constant 0 : i32
    %c0_i32_0 = arith.constant 0 : i32
    %c0_i32_1 = arith.constant 0 : i32
    return %c0_i32, %c0_i32_0 : i32, i32
  }
  func.func @transform_3(%arg0: i32) -> (i32, i32) {
    %c0_i32 = arith.constant 0 : i32
    %c0_i32_0 = arith.constant 0 : i32
    %c0_i32_1 = arith.constant 0 : i32
    return %c0_i32, %c0_i32_0 : i32, i32
  }
  func.func @transform_4(%arg0: i32) -> (i32, i32) {
    %c0_i32 = arith.constant 0 : i32
    %c0_i32_0 = arith.constant 0 : i32
    %c0_i32_1 = arith.constant 0 : i32
    return %c0_i32, %c0_i32_0 : i32, i32
  }
  func.func @transform_5(%arg0: i32) -> (i32, i32) {
    %c0_i32 = arith.constant 0 : i32
    %c0_i32_0 = arith.constant 0 : i32
    %c0_i32_1 = arith.constant 0 : i32
    return %c0_i32, %c0_i32_0 : i32, i32
  }
  func.func @transform_6(%arg0: i32) -> (i32, i32) {
    %c0_i32 = arith.constant 0 : i32
    %c0_i32_0 = arith.constant 0 : i32
    %c0_i32_1 = arith.constant 0 : i32
    return %c0_i32, %c0_i32_0 : i32, i32
  }
  func.func @transform_7(%arg0: i32) -> (i32, i32) {
    %c0_i32 = arith.constant 0 : i32
    %c0_i32_0 = arith.constant 0 : i32
    %c0_i32_1 = arith.constant 0 : i32
    return %c0_i32, %c0_i32_0 : i32, i32
  }
  func.func @transform_8(%arg0: i32) -> (i32, i32) {
    %c0_i32 = arith.constant 0 : i32
    %c0_i32_0 = arith.constant 0 : i32
    return %arg0, %c0_i32 : i32, i32
  }
  func.func @transform_9(%arg0: i32) -> (i32, i32, i32) {
    %c0_i32 = arith.constant 0 : i32
    %c0_i32_0 = arith.constant 0 : i32
    %c0_i32_1 = arith.constant 0 : i32
    return %arg0, %c0_i32, %c0_i32_0 : i32, i32, i32
  }
  func.func @transform_10(%arg0: i32) -> (i32, i32, i32) {
    %c0_i32 = arith.constant 0 : i32
    %c0_i32_0 = arith.constant 0 : i32
    %c0_i32_1 = arith.constant 0 : i32
    return %arg0, %c0_i32, %c0_i32_0 : i32, i32, i32
  }
}

module attributes {stable_mosaic.version = 11 : i64} {
  func.func @_pool_head_kernel(%arg0: i32, %arg1: memref<2x16x32xbf16, #tpu.memory_space<vmem>>, %arg2: memref<1x32xf32, #tpu.memory_space<vmem>>, %arg3: memref<1x32xf32, #tpu.memory_space<vmem>>, %arg4: memref<32x128xf32, #tpu.memory_space<vmem>>, %arg5: memref<1x128xf32, #tpu.memory_space<vmem>>, %arg6: memref<2x1x128xf32, #tpu.memory_space<vmem>>) attributes {dimension_semantics = [#tpu.dimension_semantics<parallel>], iteration_bounds = array<i64: 1>, scalar_prefetch = 0 : i64, scratch_operands = 0 : i64, tpu.core_type = #tpu.core_type<tc>, window_params = [{transform_indices = @transform_0, window_bounds = array<i64: 2, 16, 32>}, {pipeline_mode = #tpu.pipeline_mode<synchronous>, transform_indices = @transform_1, window_bounds = array<i64: 1, 32>}, {pipeline_mode = #tpu.pipeline_mode<synchronous>, transform_indices = @transform_2, window_bounds = array<i64: 1, 32>}, {pipeline_mode = #tpu.pipeline_mode<synchronous>, transform_indices = @transform_3, window_bounds = array<i64: 32, 128>}, {pipeline_mode = #tpu.pipeline_mode<synchronous>, transform_indices = @transform_4, window_bounds = array<i64: 1, 128>}, {transform_indices = @transform_5, window_bounds = array<i64: 2, 1, 128>}]} {
    %c0 = arith.constant 0 : index
    %c0_0 = arith.constant 0 : index
    %c0_1 = arith.constant 0 : index
    %0 = vector.load %arg1[%c0, %c0_0, %c0_1] : memref<2x16x32xbf16, #tpu.memory_space<vmem>>, vector<2x16x32xbf16>
    %1 = arith.extf %0 : vector<2x16x32xbf16> to vector<2x16x32xf32>
    %cst = arith.constant dense<0.000000e+00> : vector<2x32xf32>
    %2 = vector.multi_reduction <add>, %1, %cst [1] : vector<2x16x32xf32> to vector<2x32xf32>
    %cst_2 = arith.constant 1.600000e+01 : f32
    %3 = vector.broadcast %cst_2 : f32 to vector<2x32xf32>
    %4 = arith.divf %2, %3 : vector<2x32xf32>
    %c0_3 = arith.constant 0 : index
    %c0_4 = arith.constant 0 : index
    %5 = vector.load %arg2[%c0_3, %c0_4] : memref<1x32xf32, #tpu.memory_space<vmem>>, vector<1x32xf32>
    %6 = vector.broadcast %5 : vector<1x32xf32> to vector<2x32xf32>
    %7 = arith.mulf %4, %6 : vector<2x32xf32>
    %c0_5 = arith.constant 0 : index
    %c0_6 = arith.constant 0 : index
    %8 = vector.load %arg3[%c0_5, %c0_6] : memref<1x32xf32, #tpu.memory_space<vmem>>, vector<1x32xf32>
    %9 = vector.broadcast %8 : vector<1x32xf32> to vector<2x32xf32>
    %10 = arith.addf %7, %9 : vector<2x32xf32>
    %c0_7 = arith.constant 0 : index
    %c0_8 = arith.constant 0 : index
    %11 = vector.load %arg4[%c0_7, %c0_8] : memref<32x128xf32, #tpu.memory_space<vmem>>, vector<32x128xf32>
    %cst_9 = arith.constant dense<0.000000e+00> : vector<2x128xf32>
    %12 = tpu.matmul %10, %11, %cst_9 {dimension_numbers = #tpu.dot_dimension_numbers<[1], [0], [0], [1], [0, 0, 1, 1], [], []>} : vector<2x32xf32>, vector<32x128xf32>, vector<2x128xf32> -> vector<2x128xf32>
    %c0_10 = arith.constant 0 : index
    %c0_11 = arith.constant 0 : index
    %13 = vector.load %arg5[%c0_10, %c0_11] : memref<1x128xf32, #tpu.memory_space<vmem>>, vector<1x128xf32>
    %14 = vector.broadcast %13 : vector<1x128xf32> to vector<2x128xf32>
    %15 = arith.addf %12, %14 : vector<2x128xf32>
    %16 = vector.shape_cast %15 : vector<2x128xf32> to vector<2x1x128xf32>
    %c0_12 = arith.constant 0 : index
    %c0_13 = arith.constant 0 : index
    %c0_14 = arith.constant 0 : index
    %17 = vector.load %arg6[%c0_12, %c0_13, %c0_14] : memref<2x1x128xf32, #tpu.memory_space<vmem>>, vector<2x1x128xf32>
    tpu.vector_store %arg6[%c0_12, %c0_13, %c0_14], %16 {strides = array<i32>} : memref<2x1x128xf32, #tpu.memory_space<vmem>>, vector<2x1x128xf32>,
    return
  }
  func.func @transform_0(%arg0: i32) -> (i32, i32, i32) {
    %c0_i32 = arith.constant 0 : i32
    %c0_i32_0 = arith.constant 0 : i32
    %c0_i32_1 = arith.constant 0 : i32
    return %arg0, %c0_i32, %c0_i32_0 : i32, i32, i32
  }
  func.func @transform_1(%arg0: i32) -> (i32, i32) {
    %c0_i32 = arith.constant 0 : i32
    %c0_i32_0 = arith.constant 0 : i32
    %c0_i32_1 = arith.constant 0 : i32
    return %c0_i32, %c0_i32_0 : i32, i32
  }
  func.func @transform_2(%arg0: i32) -> (i32, i32) {
    %c0_i32 = arith.constant 0 : i32
    %c0_i32_0 = arith.constant 0 : i32
    %c0_i32_1 = arith.constant 0 : i32
    return %c0_i32, %c0_i32_0 : i32, i32
  }
  func.func @transform_3(%arg0: i32) -> (i32, i32) {
    %c0_i32 = arith.constant 0 : i32
    %c0_i32_0 = arith.constant 0 : i32
    %c0_i32_1 = arith.constant 0 : i32
    return %c0_i32, %c0_i32_0 : i32, i32
  }
  func.func @transform_4(%arg0: i32) -> (i32, i32) {
    %c0_i32 = arith.constant 0 : i32
    %c0_i32_0 = arith.constant 0 : i32
    %c0_i32_1 = arith.constant 0 : i32
    return %c0_i32, %c0_i32_0 : i32, i32
  }
  func.func @transform_5(%arg0: i32) -> (i32, i32, i32) {
    %c0_i32 = arith.constant 0 : i32
    %c0_i32_0 = arith.constant 0 : i32
    %c0_i32_1 = arith.constant 0 : i32
    return %arg0, %c0_i32, %c0_i32_0 : i32, i32, i32
  }
}

</mosaic_0001>

<bundles_post_ra>
// kernel: convmixer_forward.6
= control target key start
LH: loop header
LB: loop body
LE: loop exit
PB: predicated region body
PF: predicated region fallthrough
CT: control target
= control target key end

     0   :  { %vm391_vm5 = vcmask 257024   ;;  %s804_s1 = inlined_call_operand.vmem [shape: bf16[256,32], index: 1, kind: input, shape index: {}]   ;;  %s805_s2 = inlined_call_operand.vmem [shape: f32[1,32], index: 2, kind: input, shape index: {}]   ;;  %s806_s0 = inlined_call_operand.vmem [shape: bf16[32,256], index: 0, kind: input, shape index: {}]   ;;  %s807_s3 = inlined_call_operand.vmem [shape: bf16[32,32], index: 3, kind: output, shape index: {0}]   ;;  %s808_s4 = inlined_call_operand.vmem [shape: f32[1,1,32], index: 4, kind: output, shape index: {1}]   ;;  %s809_s5 = inlined_call_operand.vmem [shape: f32[1,1,32], index: 5, kind: output, shape index: {2}]  }
   0x1   :  { %v537_v0 = vld [vmem:[%s804_s1 + $0x38] sm:$0xff]  ;;  %v536_v2 = vld [vmem:[%s804_s1 + $0x30] sm:$0xff]  ;;  %v535_v4 = vld [vmem:[%s804_s1 + $0x28] sm:$0xff] }
   0x2   :  { %v545_v1 = vld [vmem:[%s804_s1 + $0x78] sm:$0xff]  ;;  %173 = vmatpush.bf16.msra.mxu0 %v537_v0  ;;  %546 = vmatpush.bf16.msra.mxu2 %v537_v0  ;;  %v544_v3 = vld [vmem:[%s804_s1 + $0x70] sm:$0xff]  ;;  %v543_v5 = vld [vmem:[%s804_s1 + $0x68] sm:$0xff] }
   0x3   :  { %192 = vmatpush.bf16.msra.mxu1 %v545_v1  ;;  %554 = vmatpush.bf16.msra.mxu3 %v545_v1  ;;  %v534_v6 = vld [vmem:[%s804_s1 + $0x20] sm:$0xff]  ;;  %v533_v8 = vld [vmem:[%s804_s1 + $0x18] sm:$0xff]  ;;  %v532_v10 = vld [vmem:[%s804_s1 + $0x10] sm:$0xff] }
   0x4   :  { %v542_v7 = vld [vmem:[%s804_s1 + $0x60] sm:$0xff]  ;;  %v541_v9 = vld [vmem:[%s804_s1 + $0x58] sm:$0xff]  ;;  %v540_v11 = vld [vmem:[%s804_s1 + $0x50] sm:$0xff] }
   0x5   :  { %v531_v12 = vld [vmem:[%s804_s1 + $0x8] sm:$0xff]  ;;  %v530_v14 = vld [vmem:[%s804_s1] sm:$0xff]  ;;  %v452_v18 = vld [vmem:[%s806_s0 + $0x10] sm:$0xf] }
   0x6   :  { %174 = vmatpush.bf16.msra.mxu0 %v536_v2  ;;  %547 = vmatpush.bf16.msra.mxu2 %v536_v2  ;;  %v539_v13 = vld [vmem:[%s804_s1 + $0x48] sm:$0xff]  ;;  %v538_v15 = vld [vmem:[%s804_s1 + $0x40] sm:$0xff]  ;;  %v529_v19 = vld [vmem:[%s806_s0 + $0x14] sm:$0xf0] }
   0x7   :  { %193 = vmatpush.bf16.msra.mxu1 %v544_v3  ;;  %555 = vmatpush.bf16.msra.mxu3 %v544_v3  ;;  %v444_v16 = vld [vmem:[%s806_s0] sm:$0xf]  ;;  %v527_v17 = vld [vmem:[%s806_s0 + $0x4] sm:$0xf0]  ;;  %v526_v20 = vld [vmem:[%s806_s0 + $0x4] sm:$0xf]  ;;  %v453_v25 = vor.u32 %v529_v19, %v452_v18 }
   0x8   :  { %v446_v21 = vld [vmem:[%s806_s0 + $0x8] sm:$0xf0]  ;;  %v528_v22 = vld [vmem:[%s806_s0 + $0x14] sm:$0xf]  ;;  %v454_v23 = vld [vmem:[%s806_s0 + $0x18] sm:$0xf0]  ;;  %v445_v24 = vor.u32 %v527_v17, %v444_v16 }
   0x9   :  { %v449_v26 = vor.u32 %v526_v20, %v446_v21  ;;  %v457_v27 = vor.u32 %v528_v22, %v454_v23  ;;  %v562_v28 = vld [vmem:[%s805_s2] ss:$0 sm:$0xff] }
   0xa   :  { %175 = vmatpush.bf16.msra.mxu0 %v535_v4  ;;  %548 = vmatpush.bf16.msra.mxu2 %v535_v4 }
   0xb   :  { %194 = vmatpush.bf16.msra.mxu1 %v543_v5  ;;  %556 = vmatpush.bf16.msra.mxu3 %v543_v5 }
   0xe   :  { %176 = vmatpush.bf16.msra.mxu0 %v534_v6  ;;  %549 = vmatpush.bf16.msra.mxu2 %v534_v6 }
   0xf   :  { %195 = vmatpush.bf16.msra.mxu1 %v542_v7  ;;  %557 = vmatpush.bf16.msra.mxu3 %v542_v7 }
  0x12   :  { %177 = vmatpush.bf16.msra.mxu0 %v533_v8  ;;  %550 = vmatpush.bf16.msra.mxu2 %v533_v8 }
  0x13   :  { %196 = vmatpush.bf16.msra.mxu1 %v541_v9  ;;  %558 = vmatpush.bf16.msra.mxu3 %v541_v9 }
  0x16   :  { %178 = vmatpush.bf16.msra.mxu0 %v532_v10  ;;  %551 = vmatpush.bf16.msra.mxu2 %v532_v10 }
  0x17   :  { %197 = vmatpush.bf16.msra.mxu1 %v540_v11  ;;  %559 = vmatpush.bf16.msra.mxu3 %v540_v11 }
  0x1a   :  { %179 = vmatpush.bf16.msra.mxu0 %v531_v12  ;;  %552 = vmatpush.bf16.msra.mxu2 %v531_v12 }
  0x1b   :  { %198 = vmatpush.bf16.msra.mxu1 %v539_v13  ;;  %560 = vmatpush.bf16.msra.mxu3 %v539_v13 }
  0x1e   :  { %180 = vmatpush.bf16.msra.mxu0 %v530_v14  ;;  %553 = vmatpush.bf16.msra.mxu2 %v530_v14 }
  0x1f   :  { %199 = vmatpush.bf16.msra.mxu1 %v538_v15  ;;  %561 = vmatpush.bf16.msra.mxu3 %v538_v15 }
  0x21   :  { %181 = vmatmul.bf16.vlgmr.msra.gmra.mxu0 %v445_v24  ;;  %186 = vmatmul.bf16.vlgmr.msra.gmra.mxu2 %v453_v25 }
  0x22   :  { %200 = vmatmul.bf16.vlgmr.msra.gmra.mxu1 %v449_v26  ;;  %205 = vmatmul.bf16.vlgmr.msra.gmra.mxu3 %v457_v27 }
  0x9e   :  { %v182_v29 = vpop.f32.mrf.mxu0 }
  0x9f   :  { %v183_v30 = vadd.f32 %v562_v28, %v182_v29  ;;  %v201_v31 = vpop.f32.mrf.mxu1 }
  0xa1   :  { %v676_v32 = vadd.f32 %v201_v31, %v183_v30 }
  0xa3   :  { %v679_v33 = vmul.f32 0.70710677, %v676_v32 }
  0xa4   :  { %v187_v34 = vpop.f32.mrf.mxu2 }
  0xa5   :  { %v219_v35 = vmul.f32 %v679_v33, %v679_v33  ;;  %v188_v36 = vadd.f32 %v562_v28, %v187_v34  ;;  %v206_v37 = vpop.f32.mrf.mxu3 }
  0xa6   :  { %v184_v38 = vpop.f32.mrf.mxu0 }
  0xa7   :  { %v683_v39 = vmin.f32 %v219_v35, 16.0  ;;  %v685_v40 = vadd.f32 %v206_v37, %v188_v36  ;;  %v185_v41 = vadd.f32 %v562_v28, %v184_v38  ;;  %v203_v42 = vpop.f32.mrf.mxu1 }
  0xa9   :  { %v221_v43 = vmul.f32 2.1237322e-06, %v683_v39  ;;  %v232_v44 = vmul.f32 3.8918573e-05, %v683_v39  ;;  %v689_v45 = vadd.f32 %v203_v42, %v185_v41  ;;  %v692_v46 = vmul.f32 0.70710677, %v685_v40 }
  0xab   :  { %v222_v47 = vadd.f32 0.00028619796, %v221_v43  ;;  %v233_v48 = vadd.f32 0.001143296, %v232_v44  ;;  %v299_v49 = vmul.f32 %v692_v46, %v692_v46  ;;  %v697_v50 = vmul.f32 0.70710677, %v689_v45 }
  0xac   :  { %v189_v51 = vpop.f32.mrf.mxu2 }
  0xad   :  { %v223_v52 = vmul.f32 %v222_v47, %v683_v39  ;;  %v234_v53 = vmul.f32 %v233_v48, %v683_v39  ;;  %v190_v54 = vadd.f32 %v562_v28, %v189_v51  ;;  %v701_v55 = vmin.f32 %v299_v49, 16.0  ;;  %v208_v57 = vpop.f32.mrf.mxu3 }
  0xae   :  { %v259_v56 = vmul.f32 %v697_v50, %v697_v50 }
  0xaf   :  { %v224_v58 = vadd.f32 0.0036580483, %v223_v52  ;;  %v235_v59 = vadd.f32 0.014752088, %v234_v53  ;;  %v705_v60 = vadd.f32 %v208_v57, %v190_v54  ;;  %v301_v61 = vmul.f32 2.1237322e-06, %v701_v55 }
  0xb0   :  { %v312_v62 = vmul.f32 3.8918573e-05, %v701_v55  ;;  %v709_v63 = vmin.f32 %v259_v56, 16.0 }
  0xb1   :  { %v225_v0 = vmul.f32 %v224_v58, %v683_v39  ;;  %v236_v1 = vmul.f32 %v235_v59, %v683_v39  ;;  %v714_v2 = vmul.f32 0.70710677, %v705_v60  ;;  %v302_v3 = vadd.f32 0.00028619796, %v301_v61 }
  0xb2   :  { %v313_v4 = vadd.f32 0.001143296, %v312_v62  ;;  %v261_v5 = vmul.f32 2.1237322e-06, %v709_v63  ;;  %v272_v7 = vmul.f32 3.8918573e-05, %v709_v63 }
  0xb3   :  { %v237_v6 = vadd.f32 0.112945676, %v236_v1  ;;  %v339_v8 = vmul.f32 %v714_v2, %v714_v2  ;;  %v303_v9 = vmul.f32 %v302_v3, %v701_v55  ;;  %v226_v12 = vadd.f32 0.05243302, %v225_v0 }
  0xb4   :  { %v314_v10 = vmul.f32 %v313_v4, %v701_v55  ;;  %v262_v11 = vadd.f32 0.00028619796, %v261_v5  ;;  %v273_v14 = vadd.f32 0.001143296, %v272_v7 }
  0xb5   :  { %v238_v13 = vmul.f32 %v237_v6, %v683_v39  ;;  %v723_v15 = vmin.f32 %v339_v8, 16.0  ;;  %v304_v18 = vadd.f32 0.0036580483, %v303_v9  ;;  %v227_v23 = vmul.f32 %v226_v12, %v683_v39 }
  0xb6   :  { %v315_v16 = vadd.f32 0.014752088, %v314_v10  ;;  %v263_v19 = vmul.f32 %v262_v11, %v709_v63  ;;  %v274_v20 = vmul.f32 %v273_v14, %v709_v63 }
  0xb7   :  { %v239_v17 = vadd.f32 0.4994258, %v238_v13  ;;  %v352_v22 = vmul.f32 3.8918573e-05, %v723_v15  ;;  %v341_v27 = vmul.f32 2.1237322e-06, %v723_v15  ;;  %v305_v29 = vmul.f32 %v304_v18, %v701_v55 }
  0xb8   :  { %v316_v21 = vmul.f32 %v315_v16, %v701_v55  ;;  %v275_v25 = vadd.f32 0.014752088, %v274_v20  ;;  %v264_v30 = vadd.f32 0.0036580483, %v263_v19  ;;  %v228_v36 = vadd.f32 0.18741608, %v227_v23 }
  0xb9   :  { %v240_v24 = vmul.f32 %v239_v17, %v683_v39  ;;  %v353_v35 = vadd.f32 0.001143296, %v352_v22  ;;  %v342_v38 = vadd.f32 0.00028619796, %v341_v27  ;;  %v306_v42 = vadd.f32 0.05243302, %v305_v29 }
  0xba   :  { %v317_v26 = vadd.f32 0.112945676, %v316_v21  ;;  %v276_v31 = vmul.f32 %v275_v25, %v709_v63  ;;  %v265_v43 = vmul.f32 %v264_v30, %v709_v63  ;;  %v229_v48 = vmul.f32 %v228_v36, %v683_v39 }
  0xbb   :  { %v241_v28 = vadd.f32 1.0, %v240_v24  ;;  %v354_v41 = vmul.f32 %v353_v35, %v723_v15  ;;  %v343_v53 = vmul.f32 %v342_v38, %v723_v15  ;;  %v307_v56 = vmul.f32 %v306_v42, %v701_v55 }
  0xbc   :  { %v318_v34 = vmul.f32 %v317_v26, %v701_v55  ;;  %v277_v44 = vadd.f32 0.112945676, %v276_v31  ;;  %v266_v57 = vadd.f32 0.05243302, %v265_v43  ;;  %v230_v62 = vadd.f32 1.1283791, %v229_v48 }
  0xbd   :  { %563 = vrcp.f32 %v241_v28  ;;  %v355_v51 = vadd.f32 0.014752088, %v354_v41  ;;  %v344_v1 = vadd.f32 0.0036580483, %v343_v53  ;;  %v251_v4 = vand.u32 2147483647, %v241_v28 }
  0xbe   :  { %v319_v37 = vadd.f32 0.4994258, %v318_v34  ;;  %v278_v49 = vmul.f32 %v277_v44, %v709_v63  ;;  %v253_v5 = vand.u32 2147483648, %v241_v28  ;;  %v308_v6 = vadd.f32 0.18741608, %v307_v56 }
  0xbf   :  { %v356_v59 = vmul.f32 %v355_v51, %v723_v15  ;;  %v267_v7 = vmul.f32 %v266_v57, %v709_v63  ;;  %vm247_vm1 = vweird.f32 %v241_v28  ;;  %v345_v13 = vmul.f32 %v344_v1, %v723_v15 }
  0xc0   :  { %v320_v47 = vmul.f32 %v319_v37, %v701_v55  ;;  %v279_v58 = vadd.f32 0.4994258, %v278_v49  ;;  %v231_v14 = vmul.f32 %v230_v62, %v679_v33  ;;  %v254_v16 = vor.u32 1.1754944e-38, %v253_v5 }
  0xc1   :  { %v357_v3 = vadd.f32 0.112945676, %v356_v59  ;;  %v309_v17 = vmul.f32 %v308_v6, %v701_v55  ;;  %vm252_vm3 = vcmp.eq.f32.partialorder %v251_v4, 8.507059e+37  ;;  %v268_v20 = vadd.f32 0.18741608, %v267_v7 }
  0xc2   :  { %v740_v52 = vadd.f32 1.0, %v320_v47  ;;  %v280_v39 = vmul.f32 %v279_v58, %v709_v63  ;;  %v346_v26 = vadd.f32 0.05243302, %v345_v13  ;;  %v211_v30 = vmul.f32 0.5, %v676_v32 }
  0xc3   :  { %v564_v54 = vpop.eup %563  ;;  %v358_v10 = vmul.f32 %v357_v3, %v723_v15  ;;  %v269_v34 = vmul.f32 %v268_v20, %v709_v63  ;;  %v213_v59 = vmul.f32 0.5, %v685_v40 }
  0xc4   :  { %v243_v61 = vmul.f32 %v564_v54, %v241_v28  ;;  %565 = vrcp.f32 %v740_v52  ;;  %vm248_vm0 = vweird.f32 %v564_v54  ;;  %v748_v9 = vadd.f32 1.0, %v280_v39 }
  0xc5   :  { %vm249_vm2 = vmor %vm247_vm1, %vm248_vm0  ;;  %v359_v21 = vadd.f32 0.4994258, %v358_v10  ;;  %v333_v25 = vand.u32 2147483648, %v740_v52  ;;  %v310_v28 = vadd.f32 1.1283791, %v309_v17  ;;  %vm327_vm6 = vweird.f32 %v740_v52 }
  0xc6   :  { %v244_v0 = vsub.f32 1.0, %v243_v61  ;;  %567 = vrcp.f32 %v748_v9  ;;  %v331_v29 = vand.u32 2147483647, %v740_v52  ;;  %v347_v42 = vmul.f32 %v346_v26, %v723_v15 }
  0xc7   :  { %v360_v27 = vmul.f32 %v359_v21, %v723_v15  ;;  %v334_v41 = vor.u32 1.1754944e-38, %v333_v25  ;;  %v311_v43 = vmul.f32 %v310_v28, %v692_v46  ;;  %v270_v48 = vadd.f32 1.1283791, %v269_v34 }
  0xc8   :  { %v245_v8 = vmul.f32 %v564_v54, %v244_v0  ;;  %vm332_vm8 = vcmp.eq.f32.partialorder %v331_v29, 8.507059e+37  ;;  %v293_v49 = vand.u32 2147483648, %v748_v9  ;;  %v291_v53 = vand.u32 2147483647, %v748_v9 }
  0xc9   :  { %v361_v35 = vadd.f32 1.0, %v360_v27  ;;  %v348_v56 = vadd.f32 0.18741608, %v347_v42  ;;  %vm287_vm10 = vweird.f32 %v748_v9  ;;  %v271_v61 = vmul.f32 %v270_v48, %v697_v50 }
  0xca   :  { %v566_v11 = vpop.eup %565  ;;  %v246_v12 = vadd.f32 %v564_v54, %v245_v8  ;;  %v294_v62 = vor.u32 1.1754944e-38, %v293_v49  ;;  %vm292_vm12 = vcmp.eq.f32.partialorder %v291_v53, 8.507059e+37  ;;  %v212_v50 = vmul.f32 0.5, %v689_v45 }
  0xcb   :  { %v323_v18 = vmul.f32 %v566_v11, %v740_v52  ;;  %vm328_vm4 = vweird.f32 %v566_v11  ;;  %569 = vrcp.f32 %v361_v35  ;;  %v349_v4 = vmul.f32 %v348_v56, %v723_v15 }
  0xcc   :  { %v250_v19 = vsel %vm249_vm2, %v564_v54, %v246_v12  ;;  %v568_v55 = vpop.eup %567  ;;  %vm329_vm7 = vmor %vm327_vm6, %vm328_vm4  ;;  %v373_v10 = vand.u32 2147483648, %v361_v35  ;;  %v371_v40 = vand.u32 2147483647, %v361_v35  ;;  %vm367_vm14 = vweird.f32 %v361_v35 }
  0xcd   :  { %v255_v22 = vsel %vm252_vm3, %v254_v16, %v250_v19  ;;  %v324_v23 = vsub.f32 1.0, %v323_v18  ;;  %v283_v37 = vmul.f32 %v568_v55, %v748_v9  ;;  %vm288_vm9 = vweird.f32 %v568_v55 }
  0xce   :  { %v256_v24 = vmul.f32 %v255_v22, %v231_v14  ;;  %vm289_vm11 = vmor %vm287_vm10, %vm288_vm9  ;;  %v374_v16 = vor.u32 1.1754944e-38, %v373_v10  ;;  %vm372_vm0 = vcmp.eq.f32.partialorder %v371_v40, 8.507059e+37  ;;  %vm396_vm1 = vcmask 261120  }
  0xcf   :  { %v325_v33 = vmul.f32 %v566_v11, %v324_v23  ;;  %v284_v32 = vsub.f32 1.0, %v283_v37  ;;  %vm410_vm2 = vcmask 253952  }
  0xd0   :  { %v522_v31 = vclamps-f32 %v256_v24, 1.0 }
  0xd1   :  { %v326_v36 = vadd.f32 %v566_v11, %v325_v33  ;;  %v285_v52 = vmul.f32 %v568_v55, %v284_v32  ;;  %v570_v46 = vpop.eup %569  ;;  %v214_v33 = vmul.f32 0.5, %v705_v60 }
  0xd2   :  { %v379_v38 = vadd.f32 1.0, %v522_v31  ;;  %v363_v1 = vmul.f32 %v570_v46, %v361_v35  ;;  %vm368_vm13 = vweird.f32 %v570_v46 }
  0xd3   :  { %v330_v44 = vsel %vm329_vm7, %v566_v11, %v326_v36  ;;  %v286_v58 = vadd.f32 %v568_v55, %v285_v52  ;;  %v350_v11 = vadd.f32 1.1283791, %v349_v4  ;;  %vm369_vm15 = vmor %vm367_vm14, %vm368_vm13 }
  0xd4   :  { %v383_v47 = vmul.f32 %v379_v38, %v211_v30  ;;  %v335_v63 = vsel %vm332_vm8, %v334_v41, %v330_v44  ;;  %v364_v7 = vsub.f32 1.0, %v363_v1 }
  0xd5   :  { %v336_v51 = vmul.f32 %v335_v63, %v311_v43  ;;  %v290_v39 = vsel %vm289_vm11, %v568_v55, %v286_v58  ;;  %v351_v17 = vmul.f32 %v350_v11, %v714_v2 }
  0xd6   :  { %v387_v54 = vpack.c.bf16 %v383_v47, %v383_v47  ;;  %v295_v3 = vsel %vm292_vm12, %v294_v62, %v290_v39  ;;  %v365_v12 = vmul.f32 %v570_v46, %v364_v7  ;;  %v412_v22 = vmul.f32 %v383_v47, %v383_v47 }
  0xd7   :  { %v524_v57 = vclamps-f32 %v336_v51, 1.0  ;;  %v296_v6 = vmul.f32 %v295_v3, %v271_v61  ;;  %v397_v45 = vsel %vm396_vm1, %v383_v47, 0.0 }
  0xd8   :  { %392 = vst.msk [vmem:[%s807_s3] sm:$0xf] %vm391_vm5, %v387_v54  ;;  %v366_v14 = vadd.f32 %v570_v46, %v365_v12  ;;  %v416_v27 = vsel %vm396_vm1, %v412_v22, 0.0 }
  0xd9   :  { %v381_v0 = vadd.f32 1.0, %v524_v57  ;;  %v523_v9 = vclamps-f32 %v296_v6, 1.0 }
  0xda   :  { %v370_v18 = vsel %vm369_vm15, %v570_v46, %v366_v14 }
  0xdb   :  { %v385_v5 = vmul.f32 %v381_v0, %v213_v59  ;;  %v380_v13 = vadd.f32 1.0, %v523_v9  ;;  %v375_v21 = vsel %vm372_vm0, %v374_v16, %v370_v18 }
  0xdc   :  { %v376_v24 = vmul.f32 %v375_v21, %v351_v17 }
  0xdd   :  { %v389_v8 = vpack.c.bf16 %v385_v5, %v385_v5  ;;  %v384_v15 = vmul.f32 %v380_v13, %v212_v50  ;;  %v414_v28 = vmul.f32 %v385_v5, %v385_v5  ;;  %v400_v30 = vsel %vm396_vm1, %v385_v5, 0.0 }
  0xde   :  { %v525_v2 = vclamps-f32 %v376_v24, 1.0 }
  0xdf   :  { %394 = vst.msk [vmem:[%s807_s3 + $0x8] sm:$0xf] %vm391_vm5, %v389_v8  ;;  %v388_v19 = vpack.c.bf16 %v384_v15, %v384_v15  ;;  %v413_v20 = vmul.f32 %v384_v15, %v384_v15  ;;  %v398_v23 = vsel %vm396_vm1, %v384_v15, 0.0  ;;  %v419_v35 = vsel %vm396_vm1, %v414_v28, 0.0 }
  0xe0   :  { %v399_v26 = vadd.f32 %v398_v23, %v397_v45  ;;  %v382_v29 = vadd.f32 1.0, %v525_v2 }
  0xe1   :  { %393 = vst.msk [vmem:[%s807_s3 + $0x4] sm:$0xf] %vm391_vm5, %v388_v19  ;;  %v417_v25 = vsel %vm396_vm1, %v413_v20, 0.0 }
  0xe2   :  { %v418_v55 = vadd.f32 %v417_v25, %v416_v27  ;;  %v386_v31 = vmul.f32 %v382_v29, %v214_v33  ;;  %v401_v34 = vadd.f32 %v400_v30, %v399_v26 }
  0xe4   :  { %v390_v36 = vpack.c.bf16 %v386_v31, %v386_v31  ;;  %v402_v37 = vsel %vm396_vm1, %v386_v31, 0.0  ;;  %v415_v38 = vmul.f32 %v386_v31, %v386_v31  ;;  %v420_v42 = vadd.f32 %v419_v35, %v418_v55 }
  0xe5   :  { %v403_v41 = vadd.f32 %v402_v37, %v401_v34 }
  0xe6   :  { %395 = vst.msk [vmem:[%s807_s3 + $0xc] sm:$0xf] %vm391_vm5, %v390_v36  ;;  %v421_v60 = vsel %vm396_vm1, %v415_v38, 0.0 }
  0xe7   :  { %v404_v43 = vrot.slane %v403_v41, 4  ;;  %v422_v44 = vadd.f32 %v421_v60, %v420_v42 }
  0xe9   :  { %v405_v32 = vadd.f32 %v404_v43, %v403_v41  ;;  %v423_v47 = vrot.slane %v422_v44, 4 }
  0xeb   :  { %v406_v63 = vrot.slane %v405_v32, 2  ;;  %v424_v48 = vadd.f32 %v423_v47, %v422_v44 }
  0xed   :  { %v407_v49 = vadd.f32 %v406_v63, %v405_v32  ;;  %v425_v51 = vrot.slane %v424_v48, 2 }
  0xef   :  { %v408_v52 = vrot.slane %v407_v49, 1  ;;  %v426_v53 = vadd.f32 %v425_v51, %v424_v48 }
  0xf1   :  { %v409_v54 = vadd.f32 %v408_v52, %v407_v49  ;;  %v427_v56 = vrot.slane %v426_v53, 1 }
  0xf3   :  { %411 = vst.msk [vmem:[%s808_s4] sm:$0x1] %vm410_vm2, %v409_v54  ;;  %v428_v57 = vadd.f32 %v427_v56, %v426_v53 }
  0xf5   :  { %429 = vst.msk [vmem:[%s809_s5] sm:$0x1] %vm410_vm2, %v428_v57 }

// kernel: convmixer_forward.7
= control target key start
LH: loop header
LB: loop body
LE: loop exit
PB: predicated region body
PF: predicated region fallthrough
CT: control target
= control target key end

     0   :  { %s1117_s24 = smov 0   ;;  %s1119_s25 = smov 0   ;;  %s1309_s0 = inlined_call_operand.vmem [shape: bf16[2,4,4,32], index: 0, kind: input, shape index: {}]   ;;  %s1310_s1 = inlined_call_operand.vmem [shape: f32[1,32], index: 1, kind: input, shape index: {}]   ;;  %s1311_s2 = inlined_call_operand.vmem [shape: f32[1,32], index: 2, kind: input, shape index: {}]   ;;  %s1312_s3 = inlined_call_operand.vmem [shape: f32[9,32], index: 3, kind: input, shape index: {}]   ;;  %s1313_s4 = inlined_call_operand.vmem [shape: f32[1,32], index: 4, kind: input, shape index: {}]   ;;  %s1314_s5 = inlined_call_operand.vmem [shape: bf16[2,4,4,32], index: 5, kind: output, shape index: {0}]   ;;  %s1315_s6 = inlined_call_operand.vmem [shape: f32[2,1,32], index: 6, kind: output, shape index: {1}]   ;;  %s1316_s7 = inlined_call_operand.vmem [shape: f32[2,1,32], index: 7, kind: output, shape index: {2}]  }
   0x1   :  { %s1121_s26 = smov 0  }
   0x2 LB: > { %s30_s27 = sadd.s32 1, %s1070_s25  ;;  %p994_p0 = scmp.ge.s32.totalorder %s1074_s26, 1  ;;  %s1074_s26 = sphi %s1121_s26, %s18_s26   ;;  %s1070_s25 = sphi %s1119_s25, %s1318_s25   ;;  %s1066_s24 = sphi %s1117_s24, %s1317_s24  }
   0x3   : > { %p32_p1 = scmp.ge.s32.totalorder %s30_s27, 2  ;;  %p298_p2 = scmp.lt.s32.totalorder %s1074_s26, 3 }
   0x5   : > { %s1320_s27 = smov (%p32_p1, %s30_s27), 0  ;;  %p299_p3 = pnand %p994_p0, %p298_p2 }
   0x6   : > { %p361_p4 = scmp.lt.s32.totalorder (!%p299_p3), %s1066_s24, 1 }
   0x7   : > { %302 = sbr.rel (%p299_p3) target bundleno = 134 (0x86), region = 40 }
   0xc   : > { %vm428_vm0 = vcmask 258048   ;;  %v1076_v0 = vmov 0.0   ;;  %s1322_s24 = smov (!%p361_p4, %s1066_s24), 1  ;;  %v1032_v1 = vld [vmem:[%s1310_s1] ss:$0 sm:$0xff]  ;;  %vm426_vm1 = vcmask 261120  }
   0xd   : > { %438 = vst.msk [vmem:[#allocation2 + $0x18] sm:$0x1f] %vm428_vm0, %v1076_v0  ;;  %s1005_s30 = sshll.u32 %s1322_s24, 3  ;;  %v1033_v2 = vld [vmem:[%s1311_s2] ss:$0 sm:$0xff]  ;;  %vm442_vm2 = vcmask 257024   ;;  %s395_s19 = scalar_lea.vmem %s1315_s6, %s1322_s24 }
   0xe   : > { %429 = vst.msk [vmem:[#allocation2 + $0x8] sm:$0x1f] %vm428_vm0, %v1076_v0  ;;  %s368_s10 = scalar_lea.vmem %s1309_s0, %s1005_s30  ;;  %v1034_v19 = vld [vmem:[%s1312_s3] ss:$0 sm:$0xff]  ;;  %v1035_v21 = vld [vmem:[%s1312_s3 + $0x3] ss:$0 sm:$0xff]  ;;  %s1270_s17 = scalar_lea.vmem %s1314_s5, %s1005_s30 }
   0xf   : > { %432 = vst.msk [vmem:[#allocation2 + $0x58] sm:$0x1f] %vm428_vm0, %v1076_v0  ;;  %v404_v3 = vld [vmem:[%s368_s10] sm:$0x3]  ;;  %v405_v4 = vld [vmem:[%s368_s10 + $0x2] sm:$0x3]  ;;  %s401_s22 = scalar_lea.vmem %s1316_s7, %s1322_s24 }
  0x10   : > { %439 = vst.msk [vmem:[#allocation2 + $0x28] sm:$0x1f] %vm428_vm0, %v1076_v0  ;;  %v408_v5 = vunpack.c.l.bf16 %v404_v3  ;;  %v409_v6 = vunpack.c.l.bf16 %v405_v4  ;;  %v406_v7 = vld [vmem:[%s368_s10 + $0x4] sm:$0x3]  ;;  %v407_v8 = vld [vmem:[%s368_s10 + $0x6] sm:$0x3] }
  0x11   : > { %440 = vst.msk [vmem:[#allocation2 + $0x38] sm:$0x1f] %vm428_vm0, %v1076_v0  ;;  %v410_v9 = vunpack.c.l.bf16 %v406_v7  ;;  %v411_v10 = vunpack.c.l.bf16 %v407_v8  ;;  %v1036_v23 = vld [vmem:[%s1312_s3 + $0x6] ss:$0 sm:$0xff]  ;;  %v1037_v27 = vld [vmem:[%s1312_s3 + $0x1] ss:$0 sm:$0xff] }
  0x12   : > { %441 = vst.msk [vmem:[#allocation2 + $0x48] sm:$0x1f] %vm428_vm0, %v1076_v0  ;;  %v415_v11 = vmul.f32 %v1032_v1, %v408_v5  ;;  %v416_v12 = vmul.f32 %v1032_v1, %v409_v6  ;;  %v1038_v35 = vld [vmem:[%s1312_s3 + $0x4] ss:$0 sm:$0xff]  ;;  %v1039_v37 = vld [vmem:[%s1312_s3 + $0x7] ss:$0 sm:$0xff] }
  0x13   : > { %427 = vst.msk [vmem:[#allocation2] sm:$0xff] %vm426_vm1, %v1076_v0  ;;  %v417_v13 = vmul.f32 %v1032_v1, %v410_v9  ;;  %v418_v14 = vmul.f32 %v1032_v1, %v411_v10  ;;  %v1040_v46 = vld [vmem:[%s1312_s3 + $0x2] ss:$0 sm:$0xff]  ;;  %v1041_v57 = vld [vmem:[%s1312_s3 + $0x5] ss:$0 sm:$0xff]  ;;  %vm743_vm15 = vcmask 254976  }
  0x14   : > { %431 = vst.msk [vmem:[#allocation2 + $0x50] sm:$0xff] %vm426_vm1, %v1076_v0  ;;  %v422_v15 = vadd.f32 %v1033_v2, %v415_v11  ;;  %v423_v16 = vadd.f32 %v1033_v2, %v416_v12  ;;  %v1042_v4 = vld [vmem:[%s1312_s3 + $0x8] ss:$0 sm:$0xff] }
  0x15   : > { %434 = vst.msk [vmem:[#allocation2 + $0x10] sm:$0xff] %vm426_vm1, %v1076_v0  ;;  %v424_v17 = vadd.f32 %v1033_v2, %v417_v13  ;;  %v425_v18 = vadd.f32 %v1033_v2, %v418_v14  ;;  %v483_v29 = vld [vmem:[#allocation2 + $0x8] sm:$0xf] }
  0x16   : > { %435 = vst.msk [vmem:[#allocation2 + $0x20] sm:$0xff] %vm426_vm1, %v1076_v0  ;;  %v491_v42 = vmul.f32 %v1037_v27, %v483_v29  ;;  %v519_v52 = vld [vmem:[#allocation2 + $0x9] sm:$0xf] }
  0x17   : > { %436 = vst.msk [vmem:[#allocation2 + $0x30] sm:$0xff] %vm426_vm1, %v1076_v0  ;;  %v527_v3 = vmul.f32 %v1040_v46, %v519_v52 }
  0x18   : > { %437 = vst.msk [vmem:[#allocation2 + $0x40] sm:$0xff] %vm426_vm1, %v1076_v0 }
  0x19   : > { %443 = vst.msk [vmem:[#allocation2 + $0x18] sm:$0xf] %vm442_vm2, %v422_v15 }
  0x1a   : > { %444 = vst.msk [vmem:[#allocation2 + $0x28] sm:$0xf] %vm442_vm2, %v423_v16  ;;  %v447_v20 = vld [vmem:[#allocation2 + $0x7] sm:$0xf] }
  0x1b   : > { %445 = vst.msk [vmem:[#allocation2 + $0x38] sm:$0xf] %vm442_vm2, %v424_v17  ;;  %v455_v22 = vmul.f32 %v1034_v19, %v447_v20  ;;  %v452_v39 = vld [vmem:[#allocation2 + $0x57] sm:$0xf] }
  0x1c   : > { %446 = vst.msk [vmem:[#allocation2 + $0x48] sm:$0xf] %vm442_vm2, %v425_v18  ;;  %v478_v55 = vmul.f32 %v1036_v23, %v452_v39  ;;  %v488_v20 = vld [vmem:[#allocation2 + $0x58] sm:$0xf] }
  0x20   : > { %v448_v24 = vld [vmem:[#allocation2 + $0x17] sm:$0xf] }
  0x21   : > { %v449_v25 = vld [vmem:[#allocation2 + $0x27] sm:$0xf]  ;;  %v465_v26 = vmul.f32 %v1035_v21, %v448_v24  ;;  %v456_v28 = vmul.f32 %v1034_v19, %v448_v24  ;;  %v484_v34 = vld [vmem:[#allocation2 + $0x18] sm:$0xf] }
  0x22   : > { %v450_v30 = vld [vmem:[#allocation2 + $0x37] sm:$0xf]  ;;  %v466_v31 = vmul.f32 %v1035_v21, %v449_v25  ;;  %v475_v33 = vmul.f32 %v1036_v23, %v449_v25  ;;  %v485_v41 = vld [vmem:[#allocation2 + $0x28] sm:$0xf]  ;;  %v457_v44 = vmul.f32 %v1034_v19, %v449_v25  ;;  %v492_v48 = vmul.f32 %v1037_v27, %v484_v34 }
  0x23   : > { %v469_v32 = vadd.f32 %v465_v26, %v455_v22  ;;  %v476_v36 = vmul.f32 %v1036_v23, %v450_v30  ;;  %v451_v43 = vld [vmem:[#allocation2 + $0x47] sm:$0xf]  ;;  %v467_v45 = vmul.f32 %v1035_v21, %v450_v30  ;;  %v501_v51 = vmul.f32 %v1038_v35, %v484_v34  ;;  %v486_v53 = vld [vmem:[#allocation2 + $0x38] sm:$0xf] }
  0x24   : > { %v470_v38 = vadd.f32 %v466_v31, %v456_v28  ;;  %v477_v49 = vmul.f32 %v1036_v23, %v451_v43  ;;  %v511_v56 = vmul.f32 %v1039_v37, %v485_v41  ;;  %v502_v59 = vmul.f32 %v1038_v35, %v485_v41  ;;  %v520_v62 = vld [vmem:[#allocation2 + $0x19] sm:$0xf]  ;;  %v487_v0 = vld [vmem:[#allocation2 + $0x48] sm:$0xf]  ;;  %v1043_v28 = vld [vmem:[%s1313_s4] ss:$0 sm:$0xff] }
  0x25   : > { %v479_v40 = vadd.f32 %v475_v33, %v469_v32  ;;  %v471_v54 = vadd.f32 %v467_v45, %v457_v44  ;;  %v458_v60 = vmul.f32 %v1034_v19, %v450_v30  ;;  %v493_v1 = vmul.f32 %v1037_v27, %v485_v41  ;;  %v521_v8 = vld [vmem:[#allocation2 + $0x29] sm:$0xf]  ;;  %v522_v17 = vld [vmem:[#allocation2 + $0x39] sm:$0xf] }
  0x26   : > { %v480_v47 = vadd.f32 %v476_v36, %v470_v38  ;;  %v468_v2 = vmul.f32 %v1035_v21, %v451_v43  ;;  %v512_v6 = vmul.f32 %v1039_v37, %v486_v53  ;;  %v503_v10 = vmul.f32 %v1038_v35, %v486_v53  ;;  %v523_v30 = vld [vmem:[#allocation2 + $0x49] sm:$0xf] }
  0x27   : > { %v495_v50 = vadd.f32 %v491_v42, %v479_v40  ;;  %v481_v63 = vadd.f32 %v477_v49, %v471_v54  ;;  %v537_v12 = vmul.f32 %v1041_v57, %v520_v62  ;;  %v528_v14 = vmul.f32 %v1040_v46, %v520_v62  ;;  %v524_v49 = vld [vmem:[#allocation2 + $0x59] sm:$0xf] }
  0x28   : > { %v496_v58 = vadd.f32 %v492_v48, %v480_v47  ;;  %v472_v11 = vadd.f32 %v468_v2, %v458_v60  ;;  %v513_v15 = vmul.f32 %v1039_v37, %v487_v0  ;;  %v494_v21 = vmul.f32 %v1037_v27, %v486_v53 }
  0x29   : > { %v505_v61 = vadd.f32 %v501_v51, %v495_v50  ;;  %v497_v9 = vadd.f32 %v493_v1, %v481_v63  ;;  %v547_v22 = vmul.f32 %v1042_v4, %v521_v8  ;;  %v538_v24 = vmul.f32 %v1041_v57, %v521_v8 }
  0x2a   : > { %v506_v5 = vadd.f32 %v502_v59, %v496_v58  ;;  %v482_v19 = vadd.f32 %v478_v55, %v472_v11  ;;  %v529_v25 = vmul.f32 %v1040_v46, %v521_v8  ;;  %v504_v32 = vmul.f32 %v1038_v35, %v487_v0 }
  0x2b   : > { %v515_v7 = vadd.f32 %v511_v56, %v505_v61  ;;  %v507_v18 = vadd.f32 %v503_v10, %v497_v9  ;;  %v548_v34 = vmul.f32 %v1042_v4, %v522_v17  ;;  %v514_v36 = vmul.f32 %v1039_v37, %v488_v20 }
  0x2c   : > { %v516_v13 = vadd.f32 %v512_v6, %v506_v5  ;;  %v498_v31 = vadd.f32 %v494_v21, %v482_v19  ;;  %v539_v40 = vmul.f32 %v1041_v57, %v522_v17  ;;  %v549_v42 = vmul.f32 %v1042_v4, %v523_v30 }
  0x2d   : > { %v531_v16 = vadd.f32 %v527_v3, %v515_v7  ;;  %v517_v29 = vadd.f32 %v513_v15, %v507_v18  ;;  %v530_v47 = vmul.f32 %v1040_v46, %v522_v17  ;;  %v540_v37 = vmul.f32 %v1041_v57, %v523_v30 }
  0x2e   : > { %v532_v23 = vadd.f32 %v528_v14, %v516_v13  ;;  %v508_v27 = vadd.f32 %v504_v32, %v498_v31  ;;  %v550_v56 = vmul.f32 %v1042_v4, %v524_v49 }
  0x2f   : > { %v541_v26 = vadd.f32 %v537_v12, %v531_v16  ;;  %v533_v39 = vadd.f32 %v529_v25, %v517_v29 }
  0x30   : > { %v542_v33 = vadd.f32 %v538_v24, %v532_v23  ;;  %v518_v45 = vadd.f32 %v514_v36, %v508_v27 }
  0x31   : > { %v551_v38 = vadd.f32 %v547_v22, %v541_v26  ;;  %v543_v44 = vadd.f32 %v539_v40, %v533_v39 }
  0x32   : > { %v552_v41 = vadd.f32 %v548_v34, %v542_v33  ;;  %v534_v51 = vadd.f32 %v530_v47, %v518_v45 }
  0x33   : > { %v1189_v43 = vadd.f32 %v1043_v28, %v551_v38  ;;  %v553_v35 = vadd.f32 %v549_v42, %v543_v44 }
  0x34   : > { %v1191_v48 = vadd.f32 %v1043_v28, %v552_v41  ;;  %v544_v55 = vadd.f32 %v540_v37, %v534_v51 }
  0x35   : > { %v1194_v50 = vmul.f32 0.70710677, %v1189_v43  ;;  %v1201_v54 = vadd.f32 %v1043_v28, %v553_v35 }
  0x36   : > { %v1197_v52 = vmul.f32 0.70710677, %v1191_v48  ;;  %v554_v60 = vadd.f32 %v550_v56, %v544_v55 }
  0x37   : > { %v571_v53 = vmul.f32 %v1194_v50, %v1194_v50  ;;  %v1206_v59 = vmul.f32 0.70710677, %v1201_v54 }
  0x38   : > { %v611_v46 = vmul.f32 %v1197_v52, %v1197_v52  ;;  %v1214_v2 = vadd.f32 %v1043_v28, %v554_v60 }
  0x39   : > { %v572_v58 = vmin.f32 %v571_v53, 16.0  ;;  %v651_v63 = vmul.f32 %v1206_v59, %v1206_v59 }
  0x3a   : > { %v1208_v61 = vmin.f32 %v611_v46, 16.0  ;;  %v1223_v14 = vmul.f32 0.70710677, %v1214_v2 }
  0x3b   : > { %v573_v57 = vmul.f32 2.1237322e-06, %v572_v58  ;;  %v584_v62 = vmul.f32 3.8918573e-05, %v572_v58  ;;  %v1216_v5 = vmin.f32 %v651_v63, 16.0 }
  0x3c   : > { %v613_v0 = vmul.f32 2.1237322e-06, %v1208_v61  ;;  %v624_v1 = vmul.f32 3.8918573e-05, %v1208_v61  ;;  %v691_v28 = vmul.f32 %v1223_v14, %v1223_v14 }
  0x3d   : > { %v574_v3 = vadd.f32 0.00028619796, %v573_v57  ;;  %v585_v4 = vadd.f32 0.001143296, %v584_v62  ;;  %v653_v10 = vmul.f32 2.1237322e-06, %v1216_v5 }
  0x3e   : > { %v614_v6 = vadd.f32 0.00028619796, %v613_v0  ;;  %v625_v7 = vadd.f32 0.001143296, %v624_v1  ;;  %v664_v11 = vmul.f32 3.8918573e-05, %v1216_v5 }
  0x3f   : > { %v575_v8 = vmul.f32 %v574_v3, %v572_v58  ;;  %v586_v9 = vmul.f32 %v585_v4, %v572_v58  ;;  %v654_v17 = vadd.f32 0.00028619796, %v653_v10  ;;  %v1233_v27 = vmin.f32 %v691_v28, 16.0 }
  0x40   : > { %v615_v12 = vmul.f32 %v614_v6, %v1208_v61  ;;  %v626_v13 = vmul.f32 %v625_v7, %v1208_v61  ;;  %v665_v20 = vadd.f32 0.001143296, %v664_v11 }
  0x41   : > { %v576_v15 = vadd.f32 0.0036580483, %v575_v8  ;;  %v587_v16 = vadd.f32 0.014752088, %v586_v9  ;;  %v655_v23 = vmul.f32 %v654_v17, %v1216_v5  ;;  %v693_v53 = vmul.f32 2.1237322e-06, %v1233_v27 }
  0x42   : > { %v616_v18 = vadd.f32 0.0036580483, %v615_v12  ;;  %v627_v19 = vadd.f32 0.014752088, %v626_v13  ;;  %v666_v26 = vmul.f32 %v665_v20, %v1216_v5  ;;  %v704_v57 = vmul.f32 3.8918573e-05, %v1233_v27 }
  0x43   : > { %v577_v21 = vmul.f32 %v576_v15, %v572_v58  ;;  %v588_v22 = vmul.f32 %v587_v16, %v572_v58  ;;  %v656_v31 = vadd.f32 0.0036580483, %v655_v23  ;;  %v694_v0 = vadd.f32 0.00028619796, %v693_v53 }
  0x44   : > { %v617_v24 = vmul.f32 %v616_v18, %v1208_v61  ;;  %v628_v25 = vmul.f32 %v627_v19, %v1208_v61  ;;  %v667_v33 = vadd.f32 0.014752088, %v666_v26  ;;  %v705_v4 = vadd.f32 0.001143296, %v704_v57 }
  0x45   : > { %v578_v29 = vadd.f32 0.05243302, %v577_v21  ;;  %v589_v30 = vadd.f32 0.112945676, %v588_v22  ;;  %v657_v42 = vmul.f32 %v656_v31, %v1216_v5  ;;  %v695_v9 = vmul.f32 %v694_v0, %v1233_v27 }
  0x46   : > { %v629_v32 = vadd.f32 0.112945676, %v628_v25  ;;  %v618_v38 = vadd.f32 0.05243302, %v617_v24  ;;  %v668_v40 = vmul.f32 %v667_v33, %v1216_v5  ;;  %v706_v10 = vmul.f32 %v705_v4, %v1233_v27 }
  0x47   : > { %v579_v34 = vmul.f32 %v578_v29, %v572_v58  ;;  %v590_v36 = vmul.f32 %v589_v30, %v572_v58  ;;  %v658_v56 = vadd.f32 0.05243302, %v657_v42  ;;  %v564_v57 = vmul.f32 0.5, %v1191_v48 }
  0x48   : > { %v630_v39 = vmul.f32 %v629_v32, %v1208_v61  ;;  %v669_v45 = vadd.f32 0.112945676, %v668_v40  ;;  %v619_v35 = vmul.f32 %v618_v38, %v1208_v61  ;;  %v707_v20 = vadd.f32 0.014752088, %v706_v10 }
  0x49   : > { %v591_v41 = vadd.f32 0.4994258, %v590_v36  ;;  %v580_v47 = vadd.f32 0.18741608, %v579_v34  ;;  %v659_v1 = vmul.f32 %v658_v56, %v1216_v5  ;;  %v563_v56 = vmul.f32 0.5, %v1189_v43 }
  0x4a   : > { %v631_v44 = vadd.f32 0.4994258, %v630_v39  ;;  %v670_v37 = vmul.f32 %v669_v45, %v1216_v5  ;;  %v620_v63 = vadd.f32 0.18741608, %v619_v35  ;;  %v708_v28 = vmul.f32 %v707_v20, %v1233_v27 }
  0x4b   : > { %v592_v49 = vmul.f32 %v591_v41, %v572_v58  ;;  %v581_v62 = vmul.f32 %v580_v47, %v572_v58  ;;  %v660_v13 = vadd.f32 0.18741608, %v659_v1 }
  0x4c   : > { %v632_v51 = vmul.f32 %v631_v44, %v1208_v61  ;;  %v671_v60 = vadd.f32 0.4994258, %v670_v37  ;;  %v621_v7 = vmul.f32 %v620_v63, %v1208_v61  ;;  %v696_v61 = vadd.f32 0.0036580483, %v695_v9 }
  0x4d   : > { %v593_v55 = vadd.f32 1.0, %v592_v49  ;;  %v582_v6 = vadd.f32 1.1283791, %v581_v62  ;;  %v661_v26 = vmul.f32 %v660_v13, %v1216_v5  ;;  %v709_v33 = vadd.f32 0.112945676, %v708_v28 }
  0x4e   : > { %v633_v46 = vadd.f32 1.0, %v632_v51  ;;  %v672_v3 = vmul.f32 %v671_v60, %v1216_v5  ;;  %v622_v17 = vadd.f32 1.1283791, %v621_v7  ;;  %v697_v32 = vmul.f32 %v696_v61, %v1233_v27 }
  0x4f   : > { %1044 = vrcp.f32 %v593_v55  ;;  %v583_v15 = vmul.f32 %v582_v6, %v1194_v50  ;;  %v603_v16 = vand.u32 2147483647, %v593_v55  ;;  %vm599_vm3 = vweird.f32 %v593_v55 }
  0x50   : > { %1046 = vrcp.f32 %v633_v46  ;;  %v1244_v8 = vadd.f32 1.0, %v672_v3  ;;  %v605_v21 = vand.u32 2147483648, %v593_v55  ;;  %v643_v23 = vand.u32 2147483647, %v633_v46 }
  0x51   : > { %v645_v24 = vand.u32 2147483648, %v633_v46  ;;  %v623_v29 = vmul.f32 %v622_v17, %v1197_v52  ;;  %vm639_vm5 = vweird.f32 %v633_v46  ;;  %vm604_vm7 = vcmp.eq.f32.partialorder %v603_v16, 8.507059e+37 }
  0x52   : > { %1048 = vrcp.f32 %v1244_v8  ;;  %v606_v34 = vor.u32 1.1754944e-38, %v605_v21  ;;  %vm644_vm9 = vcmp.eq.f32.partialorder %v643_v23, 8.507059e+37  ;;  %v662_v52 = vadd.f32 1.1283791, %v661_v26 }
  0x53   : > { %v646_v39 = vor.u32 1.1754944e-38, %v645_v24  ;;  %v710_v40 = vmul.f32 %v709_v33, %v1233_v27  ;;  %v685_v45 = vand.u32 2147483648, %v1244_v8  ;;  %v698_v35 = vadd.f32 0.05243302, %v697_v32 }
  0x54   : > { %vm679_vm12 = vweird.f32 %v1244_v8  ;;  %v663_v7 = vmul.f32 %v662_v52, %v1206_v59  ;;  %v565_v13 = vmul.f32 0.5, %v1201_v54 }
  0x55   : > { %v1045_v11 = vpop.eup %1044  ;;  %v711_v51 = vadd.f32 0.4994258, %v710_v40  ;;  %v686_v1 = vor.u32 1.1754944e-38, %v685_v45  ;;  %v699_v3 = vmul.f32 %v698_v35, %v1233_v27 }
  0x56   : > { %v1047_v58 = vpop.eup %1046  ;;  %v595_v12 = vmul.f32 %v1045_v11, %v593_v55  ;;  %vm600_vm4 = vweird.f32 %v1045_v11  ;;  %v683_v55 = vand.u32 2147483647, %v1244_v8 }
  0x57   : > { %v635_v18 = vmul.f32 %v1047_v58, %v633_v46  ;;  %vm640_vm6 = vweird.f32 %v1047_v58  ;;  %vm601_vm8 = vmor %vm599_vm3, %vm600_vm4  ;;  %v712_v60 = vmul.f32 %v711_v51, %v1233_v27 }
  0x58   : > { %v596_v19 = vsub.f32 1.0, %v595_v12  ;;  %v1049_v30 = vpop.eup %1048  ;;  %vm641_vm10 = vmor %vm639_vm5, %vm640_vm6  ;;  %vm684_vm14 = vcmp.eq.f32.partialorder %v683_v55, 8.507059e+37  ;;  %vm761_vm5 = vcmask 253952  }
  0x59   : > { %v636_v22 = vsub.f32 1.0, %v635_v18  ;;  %v675_v5 = vmul.f32 %v1049_v30, %v1244_v8  ;;  %vm680_vm11 = vweird.f32 %v1049_v30  ;;  %v713_v4 = vadd.f32 1.0, %v712_v60 }
  0x5a   : > { %v597_v25 = vmul.f32 %v1045_v11, %v596_v19  ;;  %vm681_vm13 = vmor %vm679_vm12, %vm680_vm11 }
  0x5b   : > { %v637_v50 = vmul.f32 %v1047_v58, %v636_v22  ;;  %v676_v44 = vsub.f32 1.0, %v675_v5  ;;  %1050 = vrcp.f32 %v713_v4  ;;  %v725_v22 = vand.u32 2147483648, %v713_v4 }
  0x5c   : > { %v598_v31 = vadd.f32 %v1045_v11, %v597_v25  ;;  %v723_v24 = vand.u32 2147483647, %v713_v4  ;;  %vm719_vm1 = vweird.f32 %v713_v4 }
  0x5d   : > { %v638_v36 = vadd.f32 %v1047_v58, %v637_v50  ;;  %v677_v53 = vmul.f32 %v1049_v30, %v676_v44 }
  0x5e   : > { %v602_v38 = vsel %vm601_vm8, %v1045_v11, %v598_v31  ;;  %vm724_vm4 = vcmp.eq.f32.partialorder %v723_v24, 8.507059e+37 }
  0x5f   : > { %v607_v41 = vsel %vm604_vm7, %v606_v34, %v602_v38  ;;  %v642_v42 = vsel %vm641_vm10, %v1047_v58, %v638_v36  ;;  %v678_v63 = vadd.f32 %v1049_v30, %v677_v53  ;;  %v700_v58 = vadd.f32 0.18741608, %v699_v3 }
  0x60   : > { %v608_v47 = vmul.f32 %v607_v41, %v583_v15  ;;  %v647_v49 = vsel %vm644_vm9, %v646_v39, %v642_v42 }
  0x61   : > { %v648_v37 = vmul.f32 %v647_v49, %v623_v29  ;;  %v682_v43 = vsel %vm681_vm13, %v1049_v30, %v678_v63  ;;  %v1051_v16 = vpop.eup %1050  ;;  %v701_v17 = vmul.f32 %v700_v58, %v1233_v27  ;;  %v726_v29 = vor.u32 1.1754944e-38, %v725_v22 }
  0x62   : > { %v999_v46 = vclamps-f32 %v608_v47, 1.0  ;;  %v687_v10 = vsel %vm684_vm14, %v686_v1, %v682_v43  ;;  %v715_v19 = vmul.f32 %v1051_v16, %v713_v4  ;;  %vm720_vm0 = vweird.f32 %v1051_v16 }
  0x63   : > { %v1000_v62 = vclamps-f32 %v648_v37, 1.0  ;;  %v688_v8 = vmul.f32 %v687_v10, %v663_v7  ;;  %v702_v21 = vadd.f32 1.1283791, %v701_v17  ;;  %vm721_vm3 = vmor %vm719_vm1, %vm720_vm0 }
  0x64   : > { %v731_v0 = vadd.f32 1.0, %v999_v46  ;;  %v716_v20 = vsub.f32 1.0, %v715_v19 }
  0x65   : > { %v732_v6 = vadd.f32 1.0, %v1000_v62  ;;  %v1001_v12 = vclamps-f32 %v688_v8, 1.0  ;;  %v703_v54 = vmul.f32 %v702_v21, %v1223_v14  ;;  %v566_v14 = vmul.f32 0.5, %v1214_v2 }
  0x66   : > { %v735_v9 = vmul.f32 %v731_v0, %v563_v56  ;;  %v717_v23 = vmul.f32 %v1051_v16, %v716_v20 }
  0x67   : > { %v736_v48 = vmul.f32 %v732_v6, %v564_v57  ;;  %v733_v15 = vadd.f32 1.0, %v1001_v12 }
  0x68   : > { %v739_v11 = vpack.c.bf16 %v735_v9, %v735_v9  ;;  %v763_v25 = vmul.f32 %v735_v9, %v735_v9  ;;  %v718_v28 = vadd.f32 %v1051_v16, %v717_v23  ;;  %v748_v27 = vsel %vm442_vm2, %v735_v9, 0.0 }
  0x69   : > { %v740_v59 = vpack.c.bf16 %v736_v48, %v736_v48  ;;  %v737_v18 = vmul.f32 %v733_v15, %v565_v13  ;;  %v764_v26 = vmul.f32 %v736_v48, %v736_v48  ;;  %v749_v50 = vsel %vm442_vm2, %v736_v48, 0.0 }
  0x6a   : > { %744 = vst.msk [vmem:[%s1270_s17] sm:$0x3] %vm743_vm15, %v739_v11  ;;  %v722_v30 = vsel %vm721_vm3, %v1051_v16, %v718_v28  ;;  %v767_v33 = vsel %vm442_vm2, %v763_v25, 0.0  ;;  %v750_v36 = vadd.f32 %v749_v50, %v748_v27 }
  0x6b   : > { %745 = vst.msk [vmem:[%s1270_s17 + $0x2] sm:$0x3] %vm743_vm15, %v740_v59  ;;  %v741_v61 = vpack.c.bf16 %v737_v18, %v737_v18  ;;  %v727_v31 = vsel %vm724_vm4, %v726_v29, %v722_v30  ;;  %v768_v34 = vsel %vm442_vm2, %v764_v26, 0.0  ;;  %v765_v5 = vmul.f32 %v737_v18, %v737_v18 }
  0x6c   : > { %v728_v32 = vmul.f32 %v727_v31, %v703_v54  ;;  %v769_v39 = vadd.f32 %v768_v34, %v767_v33  ;;  %v751_v40 = vsel %vm442_vm2, %v737_v18, 0.0 }
  0x6d   : > { %746 = vst.msk [vmem:[%s1270_s17 + $0x4] sm:$0x3] %vm743_vm15, %v741_v61  ;;  %v752_v41 = vadd.f32 %v751_v40, %v750_v36  ;;  %v770_v44 = vsel %vm442_vm2, %v765_v5, 0.0 }
  0x6e   : > { %v1002_v38 = vclamps-f32 %v728_v32, 1.0  ;;  %v771_v45 = vadd.f32 %v770_v44, %v769_v39 }
  0x70   : > { %v734_v52 = vadd.f32 1.0, %v1002_v38 }
  0x72   : > { %v738_v42 = vmul.f32 %v734_v52, %v566_v14 }
  0x74   : > { %v742_v47 = vpack.c.bf16 %v738_v42, %v738_v42  ;;  %v753_v49 = vsel %vm442_vm2, %v738_v42, 0.0  ;;  %v766_v35 = vmul.f32 %v738_v42, %v738_v42 }
  0x75   : > { %v754_v51 = vadd.f32 %v753_v49, %v752_v41 }
  0x76   : > { %747 = vst.msk [vmem:[%s1270_s17 + $0x6] sm:$0x3] %vm743_vm15, %v742_v47  ;;  %v772_v37 = vsel %vm442_vm2, %v766_v35, 0.0 }
  0x77   : > { %v755_v2 = vrot.slane %v754_v51, 4  ;;  %v773_v53 = vadd.f32 %v772_v37, %v771_v45 }
  0x79   : > { %v756_v55 = vadd.f32 %v755_v2, %v754_v51  ;;  %v774_v56 = vrot.slane %v773_v53, 4 }
  0x7b   : > { %v757_v46 = vrot.slane %v756_v55, 2  ;;  %v775_v60 = vadd.f32 %v774_v56, %v773_v53 }
  0x7d   : > { %v758_v57 = vadd.f32 %v757_v46, %v756_v55  ;;  %v776_v62 = vrot.slane %v775_v60, 2 }
  0x7f   : > { %v759_v63 = vrot.slane %v758_v57, 1  ;;  %v777_v0 = vadd.f32 %v776_v62, %v775_v60 }
  0x81   : > { %v760_v1 = vadd.f32 %v759_v63, %v758_v57  ;;  %v778_v3 = vrot.slane %v777_v0, 1 }
  0x83   : > { %762 = vst.msk [vmem:[%s395_s19] sm:$0x1] %vm761_vm5, %v760_v1  ;;  %v779_v4 = vadd.f32 %v778_v3, %v777_v0 }
  0x85   : > { %780 = vst.msk [vmem:[%s401_s22] sm:$0x1] %vm761_vm5, %v779_v4 }
  0x86 PF: > { %s18_s26 = sadd.s32 1, %s1074_s26   ;;  %s1317_s24 = smov %s1070_s25 }
  0x87   : > { %p15_p5 = scmp.ge.s32.totalorder %s18_s26, 4   ;;  %s1318_s25 = smov %s1320_s27 }
  0x89   :  { %17 = sbr.rel (!%p15_p5) target bundleno = 2 (0x2), region = 108 }

// kernel: convmixer_forward.8
= control target key start
LH: loop header
LB: loop body
LE: loop exit
PB: predicated region body
PF: predicated region fallthrough
CT: control target
= control target key end

     0   :  { %vm107_vm0 = vcmask 261120   ;;  %vm313_vm10 = vcmask 257024   ;;  %s624_s6 = inlined_call_operand.vmem [shape: bf16[32,32], index: 6, kind: input, shape index: {}]   ;;  %s625_s0 = inlined_call_operand.vmem [shape: bf16[32,32], index: 0, kind: input, shape index: {}]   ;;  %s626_s1 = inlined_call_operand.vmem [shape: bf16[32,32], index: 1, kind: input, shape index: {}]   ;;  %s627_s2 = inlined_call_operand.vmem [shape: f32[1,32], index: 2, kind: input, shape index: {}]   ;;  %s628_s3 = inlined_call_operand.vmem [shape: f32[1,32], index: 3, kind: input, shape index: {}]   ;;  %s629_s4 = inlined_call_operand.vmem [shape: f32[1,32], index: 4, kind: input, shape index: {}]   ;;  %s630_s5 = inlined_call_operand.vmem [shape: f32[1,32], index: 5, kind: input, shape index: {}]   ;;  %s631_s7 = inlined_call_operand.vmem [shape: f32[1,32], index: 7, kind: input, shape index: {}]   ;;  %s632_s8 = inlined_call_operand.vmem [shape: bf16[32,32], index: 8, kind: output, shape index: {0}]   ;;  %s633_s9 = inlined_call_operand.vmem [shape: f32[1,1,32], index: 9, kind: output, shape index: {1}]   ;;  %s634_s10 = inlined_call_operand.vmem [shape: f32[1,1,32], index: 10, kind: output, shape index: {2}]  }
   0x1   :  { %v378_v0 = vld [vmem:[%s624_s6 + $0x8] sm:$0xff]  ;;  %v377_v1 = vld [vmem:[%s624_s6] sm:$0xff] }
   0x2   :  { %v380_v2 = vld [vmem:[%s625_s0] sm:$0xff]   ;;  %120 = vmatpush.bf16.msra.mxu0 %v378_v0  ;;  %397 = vmatpush.bf16.msra.mxu1 %v378_v0  ;;  %v395_v14 = vld [vmem:[%s625_s0 + $0x8] sm:$0xff]  }
   0x3   :  { %v381_v3 = vunpack.c.l.bf16 %v380_v2  ;;  %v382_v4 = vunpack.c.h.bf16 %v380_v2  ;;  %v388_v5 = vld [vmem:[%s626_s1] sm:$0xff]   ;;  %v396_v15 = vld [vmem:[%s626_s1 + $0x8] sm:$0xff]   ;;  %v385_v20 = vunpack.c.l.bf16 %v395_v14  ;;  %v386_v21 = vunpack.c.h.bf16 %v395_v14 }
   0x4   :  { %v399_v6 = vld [vmem:[%s627_s2] ss:$0 sm:$0xff]  ;;  %v389_v7 = vunpack.c.l.bf16 %v388_v5  ;;  %v390_v8 = vunpack.c.h.bf16 %v388_v5  ;;  %v393_v22 = vunpack.c.l.bf16 %v396_v15  ;;  %v394_v23 = vunpack.c.h.bf16 %v396_v15 }
   0x5   :  { %v400_v9 = vld [vmem:[%s628_s3] ss:$0 sm:$0xff]  ;;  %v53_v10 = vmul.f32 %v399_v6, %v381_v3  ;;  %v54_v11 = vmul.f32 %v399_v6, %v382_v4  ;;  %v55_v26 = vmul.f32 %v399_v6, %v385_v20  ;;  %v56_v27 = vmul.f32 %v399_v6, %v386_v21 }
   0x6   :  { %v401_v12 = vld [vmem:[%s629_s4] ss:$0 sm:$0xff]  ;;  %121 = vmatpush.bf16.msra.mxu0 %v377_v1  ;;  %398 = vmatpush.bf16.msra.mxu1 %v377_v1 }
   0x7   :  { %v402_v13 = vld [vmem:[%s630_s5] ss:$0 sm:$0xff]  ;;  %v61_v16 = vadd.f32 %v400_v9, %v53_v10  ;;  %v62_v17 = vadd.f32 %v400_v9, %v54_v11  ;;  %v69_v18 = vmul.f32 %v401_v12, %v389_v7  ;;  %v70_v19 = vmul.f32 %v401_v12, %v390_v8 }
   0x8   :  { %v71_v28 = vmul.f32 %v401_v12, %v393_v22  ;;  %v72_v29 = vmul.f32 %v401_v12, %v394_v23  ;;  %v63_v32 = vadd.f32 %v400_v9, %v55_v26  ;;  %v64_v33 = vadd.f32 %v400_v9, %v56_v27  ;;  %v403_v40 = vld [vmem:[%s631_s7] ss:$0 sm:$0xff] }
   0x9   :  { %v77_v24 = vadd.f32 %v402_v13, %v69_v18  ;;  %v78_v25 = vadd.f32 %v402_v13, %v70_v19 }
   0xa   :  { %v79_v34 = vadd.f32 %v402_v13, %v71_v28  ;;  %v80_v35 = vadd.f32 %v402_v13, %v72_v29 }
   0xb   :  { %v81_v30 = vadd.f32 %v77_v24, %v61_v16  ;;  %v82_v31 = vadd.f32 %v78_v25, %v62_v17 }
   0xc   :  { %v83_v37 = vadd.f32 %v79_v34, %v63_v32  ;;  %v84_v38 = vadd.f32 %v80_v35, %v64_v33 }
   0xd   :  { %v85_v36 = vpack.c.bf16 %v82_v31, %v81_v30 }
   0xe   :  { %v86_v39 = vpack.c.bf16 %v84_v38, %v83_v37 }
   0xf   :  { %371 = vmatmul.msk.bf16.vlgmr.msra.gmra.mxu0 %vm107_vm0, %v85_v36 }
  0x10   :  { %372 = vmatmul.msk.bf16.vlgmr.msra.gmra.mxu1 %vm107_vm0, %v86_v39 }
  0x8c   :  { %v123_v41 = vpop.f32.mrf.mxu0 }
  0x8d   :  { %v502_v42 = vadd.f32 %v403_v40, %v123_v41  ;;  %v128_v44 = vpop.f32.mrf.mxu1 }
  0x8e   :  { %v507_v45 = vadd.f32 %v403_v40, %v128_v44 }
  0x8f   :  { %v505_v43 = vmul.f32 0.70710677, %v502_v42 }
  0x90   :  { %v512_v47 = vmul.f32 0.70710677, %v507_v45 }
  0x91   :  { %v141_v46 = vmul.f32 %v505_v43, %v505_v43 }
  0x92   :  { %v221_v49 = vmul.f32 %v512_v47, %v512_v47 }
  0x93   :  { %v514_v48 = vmin.f32 %v141_v46, 16.0 }
  0x94   :  { %v125_v50 = vpop.f32.mrf.mxu0  ;;  %v522_v54 = vmin.f32 %v221_v49, 16.0 }
  0x95   :  { %v143_v51 = vmul.f32 2.1237322e-06, %v514_v48  ;;  %v154_v52 = vmul.f32 3.8918573e-05, %v514_v48  ;;  %v520_v53 = vadd.f32 %v403_v40, %v125_v50  ;;  %v130_v57 = vpop.f32.mrf.mxu1 }
  0x96   :  { %v223_v58 = vmul.f32 2.1237322e-06, %v522_v54  ;;  %v234_v59 = vmul.f32 3.8918573e-05, %v522_v54  ;;  %v529_v61 = vadd.f32 %v403_v40, %v130_v57 }
  0x97   :  { %v144_v55 = vadd.f32 0.00028619796, %v143_v51  ;;  %v155_v56 = vadd.f32 0.001143296, %v154_v52  ;;  %v527_v60 = vmul.f32 0.70710677, %v520_v53 }
  0x98   :  { %v224_v0 = vadd.f32 0.00028619796, %v223_v58  ;;  %v235_v1 = vadd.f32 0.001143296, %v234_v59  ;;  %v536_v5 = vmul.f32 0.70710677, %v529_v61 }
  0x99   :  { %v145_v62 = vmul.f32 %v144_v55, %v514_v48  ;;  %v156_v63 = vmul.f32 %v155_v56, %v514_v48  ;;  %v181_v2 = vmul.f32 %v527_v60, %v527_v60 }
  0x9a   :  { %v225_v6 = vmul.f32 %v224_v0, %v522_v54  ;;  %v236_v7 = vmul.f32 %v235_v1, %v522_v54  ;;  %v261_v10 = vmul.f32 %v536_v5, %v536_v5 }
  0x9b   :  { %v146_v3 = vadd.f32 0.0036580483, %v145_v62  ;;  %v157_v4 = vadd.f32 0.014752088, %v156_v63  ;;  %v540_v8 = vmin.f32 %v181_v2, 16.0 }
  0x9c   :  { %v226_v12 = vadd.f32 0.0036580483, %v225_v6  ;;  %v237_v13 = vadd.f32 0.014752088, %v236_v7  ;;  %v549_v19 = vmin.f32 %v261_v10, 16.0 }
  0x9d   :  { %v158_v9 = vmul.f32 %v157_v4, %v514_v48  ;;  %v147_v11 = vmul.f32 %v146_v3, %v514_v48  ;;  %v183_v14 = vmul.f32 2.1237322e-06, %v540_v8  ;;  %v194_v16 = vmul.f32 3.8918573e-05, %v540_v8 }
  0x9e   :  { %v238_v17 = vmul.f32 %v237_v13, %v522_v54  ;;  %v227_v21 = vmul.f32 %v226_v12, %v522_v54  ;;  %v263_v28 = vmul.f32 2.1237322e-06, %v549_v19  ;;  %v274_v30 = vmul.f32 3.8918573e-05, %v549_v19 }
  0x9f   :  { %v159_v15 = vadd.f32 0.112945676, %v158_v9  ;;  %v184_v18 = vadd.f32 0.00028619796, %v183_v14  ;;  %v195_v22 = vadd.f32 0.001143296, %v194_v16 }
  0xa0   :  { %v148_v23 = vadd.f32 0.05243302, %v147_v11  ;;  %v239_v24 = vadd.f32 0.112945676, %v238_v17  ;;  %v228_v32 = vadd.f32 0.05243302, %v227_v21 }
  0xa1   :  { %v160_v20 = vmul.f32 %v159_v15, %v514_v48  ;;  %v185_v26 = vmul.f32 %v184_v18, %v540_v8  ;;  %v196_v27 = vmul.f32 %v195_v22, %v540_v8  ;;  %v275_v36 = vadd.f32 0.001143296, %v274_v30 }
  0xa2   :  { %v240_v29 = vmul.f32 %v239_v24, %v522_v54  ;;  %v149_v34 = vmul.f32 %v148_v23, %v514_v48  ;;  %v264_v40 = vadd.f32 0.00028619796, %v263_v28  ;;  %v229_v44 = vmul.f32 %v228_v32, %v522_v54 }
  0xa3   :  { %v161_v25 = vadd.f32 0.4994258, %v160_v20  ;;  %v197_v33 = vadd.f32 0.014752088, %v196_v27  ;;  %v186_v38 = vadd.f32 0.0036580483, %v185_v26  ;;  %v276_v50 = vmul.f32 %v275_v36, %v549_v19 }
  0xa4   :  { %v241_v35 = vadd.f32 0.4994258, %v240_v29  ;;  %v150_v46 = vadd.f32 0.18741608, %v149_v34  ;;  %v265_v55 = vmul.f32 %v264_v40, %v549_v19  ;;  %v230_v56 = vadd.f32 0.18741608, %v229_v44 }
  0xa5   :  { %v162_v31 = vmul.f32 %v161_v25, %v514_v48  ;;  %v198_v39 = vmul.f32 %v197_v33, %v540_v8  ;;  %v187_v51 = vmul.f32 %v186_v38, %v540_v8  ;;  %v277_v59 = vadd.f32 0.014752088, %v276_v50 }
  0xa6   :  { %v242_v41 = vmul.f32 %v241_v35, %v522_v54  ;;  %v151_v58 = vmul.f32 %v150_v46, %v514_v48  ;;  %v266_v1 = vadd.f32 0.0036580483, %v265_v55  ;;  %v231_v6 = vmul.f32 %v230_v56, %v522_v54 }
  0xa7   :  { %v163_v37 = vadd.f32 1.0, %v162_v31  ;;  %v199_v52 = vadd.f32 0.112945676, %v198_v39  ;;  %v188_v63 = vadd.f32 0.05243302, %v187_v51  ;;  %v278_v3 = vmul.f32 %v277_v59, %v549_v19 }
  0xa8   :  { %v243_v49 = vadd.f32 1.0, %v242_v41  ;;  %v152_v10 = vadd.f32 1.1283791, %v151_v58  ;;  %v267_v15 = vmul.f32 %v266_v1, %v549_v19  ;;  %v232_v20 = vadd.f32 1.1283791, %v231_v6 }
  0xa9   :  { %404 = vrcp.f32 %v163_v37  ;;  %v200_v57 = vmul.f32 %v199_v52, %v540_v8  ;;  %v175_v4 = vand.u32 2147483648, %v163_v37  ;;  %vm169_vm1 = vweird.f32 %v163_v37 }
  0xaa   :  { %406 = vrcp.f32 %v243_v49  ;;  %v279_v12 = vadd.f32 0.112945676, %v278_v3  ;;  %v189_v48 = vmul.f32 %v188_v63, %v540_v8  ;;  %v173_v17 = vand.u32 2147483647, %v163_v37 }
  0xab   :  { %v201_v0 = vadd.f32 0.4994258, %v200_v57  ;;  %v176_v54 = vor.u32 1.1754944e-38, %v175_v4  ;;  %v253_v23 = vand.u32 2147483647, %v243_v49  ;;  %v255_v24 = vand.u32 2147483648, %v243_v49 }
  0xac   :  { %v280_v18 = vmul.f32 %v279_v12, %v549_v19  ;;  %v190_v27 = vadd.f32 0.18741608, %v189_v48  ;;  %v268_v28 = vadd.f32 0.05243302, %v267_v15  ;;  %v153_v29 = vmul.f32 %v152_v10, %v505_v43 }
  0xad   :  { %v202_v7 = vmul.f32 %v201_v0, %v540_v8  ;;  %vm174_vm5 = vcmp.eq.f32.partialorder %v173_v17, 8.507059e+37  ;;  %vm249_vm6 = vweird.f32 %v243_v49  ;;  %v233_v35 = vmul.f32 %v232_v20, %v512_v47 }
  0xae   :  { %v281_v25 = vadd.f32 0.4994258, %v280_v18  ;;  %v256_v36 = vor.u32 1.1754944e-38, %v255_v24  ;;  %vm254_vm8 = vcmp.eq.f32.partialorder %v253_v23, 8.507059e+37  ;;  %v191_v40 = vmul.f32 %v190_v27, %v540_v8 }
  0xaf   :  { %v405_v62 = vpop.eup %404  ;;  %v572_v14 = vadd.f32 1.0, %v202_v7  ;;  %v269_v43 = vmul.f32 %v268_v28, %v549_v19 }
  0xb0   :  { %v165_v2 = vmul.f32 %v405_v62, %v163_v37  ;;  %v407_v9 = vpop.eup %406  ;;  %vm170_vm2 = vweird.f32 %v405_v62  ;;  %v282_v31 = vmul.f32 %v281_v25, %v549_v19  ;;  %v192_v55 = vadd.f32 1.1283791, %v191_v40 }
  0xb1   :  { %v245_v13 = vmul.f32 %v407_v9, %v243_v49  ;;  %408 = vrcp.f32 %v572_v14  ;;  %vm171_vm3 = vmor %vm169_vm1, %vm170_vm2  ;;  %vm250_vm4 = vweird.f32 %v407_v9  ;;  %v133_v49 = vmul.f32 0.5, %v502_v42 }
  0xb2   :  { %v166_v11 = vsub.f32 1.0, %v165_v2  ;;  %vm251_vm7 = vmor %vm249_vm6, %vm250_vm4  ;;  %v283_v37 = vadd.f32 1.0, %v282_v31  ;;  %v215_v56 = vand.u32 2147483648, %v572_v14  ;;  %v270_v57 = vadd.f32 0.18741608, %v269_v43 }
  0xb3   :  { %v246_v21 = vsub.f32 1.0, %v245_v13  ;;  %v213_v8 = vand.u32 2147483647, %v572_v14  ;;  %vm209_vm11 = vweird.f32 %v572_v14  ;;  %v193_v6 = vmul.f32 %v192_v55, %v527_v60 }
  0xb4   :  { %v167_v16 = vmul.f32 %v405_v62, %v166_v11  ;;  %410 = vrcp.f32 %v283_v37  ;;  %v216_v3 = vor.u32 1.1754944e-38, %v215_v56  ;;  %v271_v4 = vmul.f32 %v270_v57, %v549_v19 }
  0xb5   :  { %v247_v26 = vmul.f32 %v407_v9, %v246_v21  ;;  %vm214_vm13 = vcmp.eq.f32.partialorder %v213_v8, 8.507059e+37  ;;  %v295_v13 = vand.u32 2147483648, %v283_v37  ;;  %v293_v15 = vand.u32 2147483647, %v283_v37 }
  0xb6   :  { %v168_v22 = vadd.f32 %v405_v62, %v167_v16  ;;  %v272_v19 = vadd.f32 1.1283791, %v271_v4  ;;  %v134_v60 = vmul.f32 0.5, %v520_v53  ;;  %vm289_vm15 = vweird.f32 %v283_v37 }
  0xb7   :  { %v248_v33 = vadd.f32 %v407_v9, %v247_v26  ;;  %v409_v38 = vpop.eup %408  ;;  %vm294_vm2 = vcmp.eq.f32.partialorder %v293_v15, 8.507059e+37 }
  0xb8   :  { %v172_v30 = vsel %vm171_vm3, %v405_v62, %v168_v22  ;;  %v205_v46 = vmul.f32 %v409_v38, %v572_v14  ;;  %vm210_vm9 = vweird.f32 %v409_v38  ;;  %v135_v62 = vmul.f32 0.5, %v507_v45 }
  0xb9   :  { %v177_v32 = vsel %vm174_vm5, %v176_v54, %v172_v30  ;;  %v252_v39 = vsel %vm251_vm7, %v407_v9, %v248_v33  ;;  %vm211_vm12 = vmor %vm209_vm11, %vm210_vm9  ;;  %v273_v18 = vmul.f32 %v272_v19, %v536_v5  ;;  %v296_v54 = vor.u32 1.1754944e-38, %v295_v13 }
  0xba   :  { %v178_v34 = vmul.f32 %v177_v32, %v153_v29  ;;  %v257_v44 = vsel %vm254_vm8, %v256_v36, %v252_v39  ;;  %v206_v47 = vsub.f32 1.0, %v205_v46  ;;  %v411_v42 = vpop.eup %410  ;;  %vm331_vm3 = vcmask 253952  }
  0xbb   :  { %v258_v50 = vmul.f32 %v257_v44, %v233_v35  ;;  %v285_v45 = vmul.f32 %v411_v42, %v283_v37  ;;  %vm290_vm14 = vweird.f32 %v411_v42 }
  0xbc   :  { %v373_v41 = vclamps-f32 %v178_v34, 1.0  ;;  %v207_v59 = vmul.f32 %v409_v38, %v206_v47  ;;  %vm291_vm1 = vmor %vm289_vm15, %vm290_vm14  ;;  %v136_v34 = vmul.f32 0.5, %v529_v61 }
  0xbd   :  { %v375_v52 = vclamps-f32 %v258_v50, 1.0  ;;  %v286_v12 = vsub.f32 1.0, %v285_v45 }
  0xbe   :  { %v301_v51 = vadd.f32 1.0, %v373_v41  ;;  %v208_v1 = vadd.f32 %v409_v38, %v207_v59 }
  0xbf   :  { %v303_v63 = vadd.f32 1.0, %v375_v52  ;;  %v287_v14 = vmul.f32 %v411_v42, %v286_v12 }
  0xc0   :  { %v305_v58 = vmul.f32 %v301_v51, %v133_v49  ;;  %v212_v7 = vsel %vm211_vm12, %v409_v38, %v208_v1 }
  0xc1   :  { %v307_v2 = vmul.f32 %v303_v63, %v135_v62  ;;  %v217_v10 = vsel %vm214_vm13, %v216_v3, %v212_v7  ;;  %v288_v17 = vadd.f32 %v411_v42, %v287_v14 }
  0xc2   :  { %v309_v0 = vpack.c.bf16 %v305_v58, %v305_v58  ;;  %v218_v11 = vmul.f32 %v217_v10, %v193_v6  ;;  %v333_v20 = vmul.f32 %v305_v58, %v305_v58  ;;  %v318_v23 = vsel %vm107_vm0, %v305_v58, 0.0 }
  0xc3   :  { %v311_v9 = vpack.c.bf16 %v307_v2, %v307_v2  ;;  %v292_v22 = vsel %vm291_vm1, %v411_v42, %v288_v17  ;;  %v335_v30 = vmul.f32 %v307_v2, %v307_v2  ;;  %v321_v33 = vsel %vm107_vm0, %v307_v2, 0.0 }
  0xc4   :  { %314 = vst.msk [vmem:[%s632_s8] sm:$0xf] %vm313_vm10, %v309_v0  ;;  %v374_v48 = vclamps-f32 %v218_v11, 1.0  ;;  %v297_v24 = vsel %vm294_vm2, %v296_v54, %v292_v22  ;;  %v337_v29 = vsel %vm107_vm0, %v333_v20, 0.0 }
  0xc5   :  { %316 = vst.msk [vmem:[%s632_s8 + $0x8] sm:$0xf] %vm313_vm10, %v311_v9  ;;  %v298_v28 = vmul.f32 %v297_v24, %v273_v18  ;;  %v340_v37 = vsel %vm107_vm0, %v335_v30, 0.0 }
  0xc6   :  { %v302_v16 = vadd.f32 1.0, %v374_v48 }
  0xc7   :  { %v376_v31 = vclamps-f32 %v298_v28, 1.0 }
  0xc8   :  { %v306_v21 = vmul.f32 %v302_v16, %v134_v60 }
  0xc9   :  { %v304_v35 = vadd.f32 1.0, %v376_v31 }
  0xca   :  { %v310_v25 = vpack.c.bf16 %v306_v21, %v306_v21  ;;  %v319_v26 = vsel %vm107_vm0, %v306_v21, 0.0  ;;  %v334_v27 = vmul.f32 %v306_v21, %v306_v21 }
  0xcb   :  { %v320_v53 = vadd.f32 %v319_v26, %v318_v23  ;;  %v308_v38 = vmul.f32 %v304_v35, %v136_v34 }
  0xcc   :  { %315 = vst.msk [vmem:[%s632_s8 + $0x4] sm:$0xf] %vm313_vm10, %v310_v25  ;;  %v338_v5 = vsel %vm107_vm0, %v334_v27, 0.0 }
  0xcd   :  { %v339_v32 = vadd.f32 %v338_v5, %v337_v29  ;;  %v322_v36 = vadd.f32 %v321_v33, %v320_v53  ;;  %v312_v40 = vpack.c.bf16 %v308_v38, %v308_v38  ;;  %v323_v43 = vsel %vm107_vm0, %v308_v38, 0.0 }
  0xce   :  { %v336_v41 = vmul.f32 %v308_v38, %v308_v38 }
  0xcf   :  { %v341_v39 = vadd.f32 %v340_v37, %v339_v32  ;;  %v324_v44 = vadd.f32 %v323_v43, %v322_v36  ;;  %317 = vst.msk [vmem:[%s632_s8 + $0xc] sm:$0xf] %vm313_vm10, %v312_v40 }
  0xd0   :  { %v342_v46 = vsel %vm107_vm0, %v336_v41, 0.0 }
  0xd1   :  { %v325_v50 = vrot.slane %v324_v44, 4  ;;  %v343_v61 = vadd.f32 %v342_v46, %v341_v39 }
  0xd3   :  { %v326_v49 = vadd.f32 %v325_v50, %v324_v44  ;;  %v344_v51 = vrot.slane %v343_v61, 4 }
  0xd5   :  { %v327_v47 = vrot.slane %v326_v49, 2  ;;  %v345_v52 = vadd.f32 %v344_v51, %v343_v61 }
  0xd7   :  { %v328_v55 = vadd.f32 %v327_v47, %v326_v49  ;;  %v346_v56 = vrot.slane %v345_v52, 2 }
  0xd9   :  { %v329_v57 = vrot.slane %v328_v55, 1  ;;  %v347_v58 = vadd.f32 %v346_v56, %v345_v52 }
  0xdb   :  { %v330_v59 = vadd.f32 %v329_v57, %v328_v55  ;;  %v348_v8 = vrot.slane %v347_v58, 1 }
  0xdd   :  { %332 = vst.msk [vmem:[%s633_s9] sm:$0x1] %vm331_vm3, %v330_v59  ;;  %v349_v62 = vadd.f32 %v348_v8, %v347_v58 }
  0xdf   :  { %350 = vst.msk [vmem:[%s634_s10] sm:$0x1] %vm331_vm3, %v349_v62 }

// kernel: convmixer_forward.11
= control target key start
LH: loop header
LB: loop body
LE: loop exit
PB: predicated region body
PF: predicated region fallthrough
CT: control target
= control target key end

     0   :  { %vm29_vm0 = vcmask 261120   ;;  %v172_v4 = vmov 16.0   ;;  %s241_s0 = inlined_call_operand.vmem [shape: bf16[2,16,32], index: 0, kind: input, shape index: {}]   ;;  %s242_s1 = inlined_call_operand.vmem [shape: f32[1,32], index: 1, kind: input, shape index: {}]   ;;  %s243_s2 = inlined_call_operand.vmem [shape: f32[1,32], index: 2, kind: input, shape index: {}]   ;;  %s244_s3 = inlined_call_operand.vmem [shape: f32[32,128], index: 3, kind: input, shape index: {}]   ;;  %s245_s4 = inlined_call_operand.vmem [shape: f32[1,128], index: 4, kind: input, shape index: {}]   ;;  %s246_s5 = inlined_call_operand.hbm [shape: f32[2,1,128], index: 5, kind: output, shape index: {}]  }
   0x1   :  { %v72_v0 = vld [vmem:[%s244_s3 + $0x18] sm:$0xff]  ;;  %v71_v1 = vld [vmem:[%s244_s3 + $0x10] sm:$0xff]  ;;  %v129_v2 = vld [vmem:[%s241_s0] sm:$0xff]   ;;  %144 = vrcp.f32 %v172_v4 }
   0x2   :  { %96 = vmatpush.msra.mxu0 %v72_v0  ;;  %v136_v3 = vld [vmem:[%s241_s0 + $0x8] sm:$0xff]   ;;  %v130_v6 = vunpack.c.l.bf16 %v129_v2  ;;  %v131_v7 = vunpack.c.h.bf16 %v129_v2  ;;  %v69_v10 = vld [vmem:[%s244_s3] sm:$0xff] }
   0x3   :  { %v70_v5 = vld [vmem:[%s244_s3 + $0x8] sm:$0xff]  ;;  %v134_v8 = vunpack.c.l.bf16 %v136_v3  ;;  %v135_v9 = vunpack.c.h.bf16 %v136_v3 }
   0x4   :  { %97 = vmatpush.msra.mxu0 %v71_v1  ;;  %v30_v11 = vsel %vm29_vm0, %v130_v6, 0.0  ;;  %v31_v12 = vsel %vm29_vm0, %v131_v7, 0.0 }
   0x5   :  { %v39_v13 = vsel %vm29_vm0, %v134_v8, 0.0  ;;  %v40_v14 = vsel %vm29_vm0, %v135_v9, 0.0 }
   0x6   :  { %10 = vsyncpa [#allocation3], 0  ;;  %98 = vmatpush.msra.mxu0 %v70_v5  ;;  %v32_v15 = vadd.f32 %v31_v12, %v30_v11  ;;  %v41_v16 = vadd.f32 %v40_v14, %v39_v13  ;;  %v141_v35 = vld [vmem:[%s242_s1] ss:$0 sm:$0xff]  ;;  %vm80_vm2 = vcmask 1041409   ;;  %s173_s1 = smov [#allocation2]  }
   0x7   :  { %v145_v17 = vpop.eup %144  ;;  %v142_v38 = vld [vmem:[%s243_s2] ss:$0 sm:$0xff]  ;;  %s113_s9 = sshll.u32 %s173_s1, 4  ;;  %s115_s12 = sshll.u32 %s246_s5, 4  ;;  %s114_s9 = int_to_ptr.vmem [resolvable:$true] %s113_s9  ;;  %s116_s12 = int_to_ptr.hbm [resolvable:$true] %s115_s12 }
   0x8   :  { %99 = vmatpush.msra.mxu0 %v69_v10  ;;  %v33_v18 = vrot.slane %v32_v15, 4  ;;  %v42_v19 = vrot.slane %v41_v16, 4  ;;  %v49_v20 = vmul.f32 16.0, %v145_v17  ;;  %vm53_vm1 = vweird.f32 %v145_v17  ;;  %v143_v45 = vld [vmem:[%s245_s4] ss:$0 sm:$0xff]  ;;  %s174_s2 = smov 16  }
   0x9   :  { %s175_s13 = smov 1  }
   0xa   :  { %v34_v21 = vadd.f32 %v33_v18, %v32_v15  ;;  %v43_v22 = vadd.f32 %v42_v19, %v41_v16  ;;  %v50_v23 = vsub.f32 1.0, %v49_v20 }
   0xc   :  { %v35_v24 = vrot.slane %v34_v21, 2  ;;  %v44_v25 = vrot.slane %v43_v22, 2  ;;  %v51_v26 = vmul.f32 %v145_v17, %v50_v23 }
   0xe   :  { %v36_v27 = vadd.f32 %v35_v24, %v34_v21  ;;  %v45_v28 = vadd.f32 %v44_v25, %v43_v22  ;;  %v52_v29 = vadd.f32 %v145_v17, %v51_v26 }
  0x10   :  { %v37_v30 = vrot.slane %v36_v27, 1  ;;  %v46_v31 = vrot.slane %v45_v28, 1  ;;  %v54_v32 = vsel %vm53_vm1, %v145_v17, %v52_v29 }
  0x12   :  { %v38_v33 = vadd.f32 %v37_v30, %v36_v27  ;;  %v47_v34 = vadd.f32 %v46_v31, %v45_v28 }
  0x14   :  { %v55_v36 = vmul.f32 %v54_v32, %v38_v33  ;;  %v56_v37 = vmul.f32 %v54_v32, %v47_v34 }
  0x16   :  { %v61_v39 = vmul.f32 %v141_v35, %v55_v36  ;;  %v62_v40 = vmul.f32 %v141_v35, %v56_v37 }
  0x18   :  { %v67_v41 = vadd.f32 %v142_v38, %v61_v39  ;;  %v68_v42 = vadd.f32 %v142_v38, %v62_v40 }
  0x1a   :  { %v79_v43 = vrot.slane %v68_v42, 7 }
  0x1c   :  { %v81_v44 = vsel %vm80_vm2, %v79_v43, %v67_v41 }
  0x1d   :  { %127 = vmatmul.msk.f32.vlgmr.msra.gmra.mxu0 %vm29_vm0, %v81_v44 }
  0x9a   :  { %v101_v46 = vpop.f32.mrf.mxu0 }
  0x9b   :  { %v102_v47 = vadd.f32 %v143_v45, %v101_v46 }
  0x9d   :  { %v105_v48 = vrot.slane %v102_v47, 1  ;;  %107 = vst [vmem:[#allocation2] sm:$0x1] %v102_v47 }
  0x9f   :  { %108 = vst [vmem:[#allocation2 + $0x1] sm:$0x1] %v105_v48 }
  0xa0   :  { %121 = dma.vmem_to_hbm [thread:$0]  %s114_s9, 32, %s116_s12, [#allocation3], %s174_s2, %s174_s2, %s175_s13  }
  0xa1   :  { %170 = dma.done.wait [#allocation3], 32  }
  0xa2   :  { %171 = vsyncadd [#allocation3], 4294967264 }
  0xa3   :  { %126 = vsyncpa [#allocation3], 1 }

</bundles_post_ra>
